<compile_context>
chip_gen: v7x
topology: tpu7x:2x2x1
jax: 0.10.0
libtpu: 0.0.40
codegen_flags: <defaults>
</compile_context>

<pallas_src>
import functools

import jax
import jax.numpy as jnp
import numpy as np
from jax.experimental import pallas as pl
from jax.experimental.pallas import tpu as pltpu

EPS = 1e-5


def _round_up(x, m):
    return (x + m - 1) // m * m


def _sum_ns(t):
    """Sum a (N, C, S) value over N and S -> (1, C, 1)."""
    return jnp.sum(jnp.sum(t, axis=2, keepdims=True), axis=0, keepdims=True)


def _conv_bn_relu_stage(xe_ref, w2d, gamma, beta, left, right, W, S, E):
    """One 3x3 conv (stride 1, pad 1, no bias) + BN(batch stats) + ReLU.

    xe_ref : (N, C, SE) VMEM scratch holding the activation at lane offset E and
             zeros elsewhere (the zero strips are the H-direction halo).
    w2d    : (Cout, 9*C), column order (kh*3 + kw)*C + c.
    gamma, beta : (1, Cout, 1).
    left, right : (1, S) masks -- 1 where the w-1 / w+1 neighbour is in-row.
    Returns (N, Cout, S) f32.
    """
    N, C, _ = xe_ref.shape
    Cout = w2d.shape[0]

    accs = []
    for n in range(N):
        rows = []
        for kh in range(3):
            for kw in range(3):
                start = E + (kh - 1) * W + (kw - 1)
                r = xe_ref[n, :, start:start + S]          # (C, S) shifted view
                if kw == 0:
                    r = r * left                           # zero wrapped w-1 taps
                elif kw == 2:
                    r = r * right                          # zero wrapped w+1 taps
                rows.append(r)
            # kh out-of-range taps read the zero strips -> no mask needed.
        slab = jnp.concatenate(rows, axis=0)               # (9*C, S), tile-aligned
        accs.append(jnp.dot(w2d, slab,                     # (Cout, S), lane-dense
                            preferred_element_type=jnp.float32))
    acc = jnp.stack(accs, axis=0)                          # (N, Cout, S)

    # BatchNorm2d (training mode): biased batch stats per channel, folded into
    # one scale + shift; centered variance for numerical robustness.
    cnt = float(N * S)
    mean = _sum_ns(acc) / cnt                              # (1, Cout, 1)
    diff = acc - mean
    var = _sum_ns(diff * diff) / cnt
    scale = gamma * jax.lax.rsqrt(var + EPS)
    return jnp.maximum(diff * scale + beta, 0.0)


def _conv_block_kernel(W, x_ref, mask_ref, w1_ref, g1_ref, b1_ref,
                       w2_ref, g2_ref, b2_ref, out_ref, xe1_ref, xe2_ref):
    N, _, S = x_ref.shape
    E = (xe1_ref.shape[2] - S) // 2                        # 128-aligned halo width

    mask = mask_ref[...]                                   # (2, S)
    left, right = mask[0:1, :], mask[1:2, :]

    # Stage 1: zero-extend the input inside VMEM (in-kernel padding).
    xe1_ref[...] = jnp.zeros(xe1_ref.shape, jnp.float32)
    xe1_ref[:, :, E:E + S] = x_ref[...]
    y1 = _conv_bn_relu_stage(xe1_ref, w1_ref[...], g1_ref[...], b1_ref[...],
                             left, right, W, S, E)

    # Stage 2: the intermediate activation never touches HBM.
    xe2_ref[...] = jnp.zeros(xe2_ref.shape, jnp.float32)
    xe2_ref[:, :, E:E + S] = y1
    y2 = _conv_bn_relu_stage(xe2_ref, w2_ref[...], g2_ref[...], b2_ref[...],
                             left, right, W, S, E)

    out_ref[...] = y2                                      # (N, Cout, S)


def _prep_weight(w_hwio, c_pad):
    """(3,3,Cin,Cout) HWIO -> (Cout, 9*c_pad); column (kh*3+kw)*c_pad + c."""
    _, _, cin, cout = w_hwio.shape
    if c_pad != cin:
        w_hwio = jnp.pad(w_hwio, ((0, 0), (0, 0), (0, c_pad - cin), (0, 0)))
    return jnp.transpose(w_hwio, (3, 0, 1, 2)).reshape(cout, -1)


def _border_masks(H, W):
    w_idx = np.tile(np.arange(W), H)
    left = (w_idx >= 1).astype(np.float32)                 # source column w-1 exists
    right = (w_idx <= W - 2).astype(np.float32)            # source column w+1 exists
    return np.stack([left, right], axis=0)                 # (2, H*W)


@jax.jit
def conv_block_forward(x_nchw, params):
    """Matches conv_block.forward(x) (training-mode BatchNorm) for NCHW input."""
    (w1, _b1, g1, be1), (w2, _b2, g2, be2) = params        # conv biases absorbed by BN
    N, Cin, H, W = x_nchw.shape
    Cout = w1.shape[-1]
    S = H * W
    E = _round_up(W + 1, 128)        # halo width (lane-aligned interior store)
    SE = S + 2 * E

    assert Cout % 8 == 0, "Cout must be a multiple of 8 (sublane tile)"
    Cp = _round_up(Cin, 8)           # pad in-channels so slab pieces are tile-aligned

    # Whole fused problem lives in VMEM; guard the footprint.
    # TODO(synk): for larger shapes, tile over N / spatial rows with BN partial
    # sums (two-pass) and a parallel grid axis (v7x has 2 TensorCores, 64 MiB VMEM).
    est_bytes = 4 * (N * Cp * (S + SE) + N * Cout * (3 * S + SE)
                     + 9 * max(Cp, Cout) * S)
    assert est_bytes < 12 * 1024 * 1024, "shape too large for fused single-block kernel"

    x_flat = x_nchw.reshape(N, Cin, S)                     # free row-major reshape
    if Cp != Cin:
        x_flat = jnp.pad(x_flat, ((0, 0), (0, Cp - Cin), (0, 0)))

    w1_2d = _prep_weight(w1, Cp)
    w2_2d = _prep_weight(w2, Cout)
    masks = jnp.asarray(_border_masks(H, W))

    kernel = functools.partial(_conv_block_kernel, W)
    out_flat = pl.pallas_call(
        kernel,
        out_shape=jax.ShapeDtypeStruct((N, Cout, S), jnp.float32),
        in_specs=[pl.BlockSpec(memory_space=pltpu.MemorySpace.VMEM)] * 8,
        out_specs=pl.BlockSpec(memory_space=pltpu.MemorySpace.VMEM),
        scratch_shapes=[pltpu.VMEM((N, Cp, SE), jnp.float32),
                        pltpu.VMEM((N, Cout, SE), jnp.float32)],
        compiler_params=pltpu.CompilerParams(vmem_limit_bytes=32 * 1024 * 1024),
    )(x_flat, masks,
      w1_2d, g1.reshape(1, Cout, 1), be1.reshape(1, Cout, 1),
      w2_2d, g2.reshape(1, Cout, 1), be2.reshape(1, Cout, 1))
    return out_flat.reshape(N, Cout, H, W)                 # free reshape, no transpose


def init_params(key, ch_in, ch_out):
    k1, k2 = jax.random.split(key, 2)

    def conv_init(k, cin, cout):
        fan_in = cin * 9
        w = jax.random.normal(k, (3, 3, cin, cout), jnp.float32) / jnp.sqrt(fan_in)
        b = jnp.linspace(-0.1, 0.1, cout, dtype=jnp.float32)
        gamma = jnp.ones((cout,), jnp.float32)             # BatchNorm2d default init
        beta = jnp.zeros((cout,), jnp.float32)
        return w, b, gamma, beta

    return (conv_init(k1, ch_in, ch_out), conv_init(k2, ch_out, ch_out))


def _reference_forward(x_nchw, params):
    """Pure-JAX reference (lax conv, with bias) for correctness checking."""
    def cbr(x, w, b, g, be):
        y = jax.lax.conv_general_dilated(
            x, w, window_strides=(1, 1), padding="SAME",
            dimension_numbers=("NCHW", "HWIO", "NCHW"))
        y = y + b.reshape(1, -1, 1, 1)
        mean = jnp.mean(y, axis=(0, 2, 3), keepdims=True)
        var = jnp.mean((y - mean) ** 2, axis=(0, 2, 3), keepdims=True)
        y = (y - mean) * jax.lax.rsqrt(var + EPS) * g.reshape(1, -1, 1, 1) \
            + be.reshape(1, -1, 1, 1)
        return jnp.maximum(y, 0.0)

    (w1, b1, g1, be1), (w2, b2, g2, be2) = params
    y = cbr(x_nchw, w1, b1, g1, be1)
    y = cbr(y, w2, b2, g2, be2)
    return y


if __name__ == "__main__":
    key = jax.random.PRNGKey(0)
    kx, kp = jax.random.split(key)

    N, CH_IN, CH_OUT, H, W = 2, 4, 8, 16, 16
    x = jax.random.normal(kx, (N, CH_IN, H, W), jnp.float32)
    params = init_params(kp, CH_IN, CH_OUT)

    out = jax.block_until_ready(conv_block_forward(x, params))
    ref = jax.block_until_ready(_reference_forward(x, params))

    assert out.shape == (N, CH_OUT, H, W), out.shape
    err = float(jnp.max(jnp.abs(out - ref)))
    assert jnp.allclose(out, ref, atol=1e-4, rtol=1e-4), err

    print("KERNEL_OK")
</pallas_src>

<mosaic_0001>
module attributes {stable_mosaic.version = 11 : i64} {
  func.func @_conv_block_kernel(%arg0: memref<2x8x256xf32, #tpu.memory_space<vmem>>, %arg1: memref<2x256xf32, #tpu.memory_space<vmem>>, %arg2: memref<8x72xf32, #tpu.memory_space<vmem>>, %arg3: memref<1x8x1xf32, #tpu.memory_space<vmem>>, %arg4: memref<1x8x1xf32, #tpu.memory_space<vmem>>, %arg5: memref<8x72xf32, #tpu.memory_space<vmem>>, %arg6: memref<1x8x1xf32, #tpu.memory_space<vmem>>, %arg7: memref<1x8x1xf32, #tpu.memory_space<vmem>>, %arg8: memref<2x8x256xf32, #tpu.memory_space<vmem>>, %arg9: memref<2x8x512xf32, #tpu.memory_space<vmem>>, %arg10: memref<2x8x512xf32, #tpu.memory_space<vmem>>) attributes {dimension_semantics = [], scalar_prefetch = 0 : i64, scratch_operands = 2 : i64, tpu.core_type = #tpu.core_type<tc>} {
    %c0 = arith.constant 0 : index
    %c0_0 = arith.constant 0 : index
    %0 = vector.load %arg1[%c0, %c0_0] : memref<2x256xf32, #tpu.memory_space<vmem>>, vector<2x256xf32>
    %1 = vector.extract_strided_slice %0 {offsets = [0, 0], sizes = [1, 256], strides = [1, 1]} : vector<2x256xf32> to vector<1x256xf32>
    %2 = vector.extract_strided_slice %0 {offsets = [1, 0], sizes = [1, 256], strides = [1, 1]} : vector<2x256xf32> to vector<1x256xf32>
    %cst = arith.constant 0.000000e+00 : f32
    %3 = vector.broadcast %cst : f32 to vector<2x8x512xf32>
    %c0_1 = arith.constant 0 : index
    %c0_2 = arith.constant 0 : index
    %c0_3 = arith.constant 0 : index
    %4 = vector.load %arg9[%c0_1, %c0_2, %c0_3] : memref<2x8x512xf32, #tpu.memory_space<vmem>>, vector<2x8x512xf32>
    tpu.vector_store %arg9[%c0_1, %c0_2, %c0_3], %3 {strides = array<i32>} : memref<2x8x512xf32, #tpu.memory_space<vmem>>, vector<2x8x512xf32>,
    %c0_4 = arith.constant 0 : index
    %c0_5 = arith.constant 0 : index
    %c0_6 = arith.constant 0 : index
    %5 = vector.load %arg0[%c0_4, %c0_5, %c0_6] : memref<2x8x256xf32, #tpu.memory_space<vmem>>, vector<2x8x256xf32>
    %c0_7 = arith.constant 0 : index
    %c0_8 = arith.constant 0 : index
    %c128 = arith.constant 128 : index
    %6 = vector.load %arg9[%c0_7, %c0_8, %c128] : memref<2x8x512xf32, #tpu.memory_space<vmem>>, vector<2x8x256xf32>
    tpu.vector_store %arg9[%c0_7, %c0_8, %c128], %5 {strides = array<i32>} : memref<2x8x512xf32, #tpu.memory_space<vmem>>, vector<2x8x256xf32>,
    %c0_9 = arith.constant 0 : index
    %c0_10 = arith.constant 0 : index
    %7 = vector.load %arg2[%c0_9, %c0_10] : memref<8x72xf32, #tpu.memory_space<vmem>>, vector<8x72xf32>
    %c0_11 = arith.constant 0 : index
    %c0_12 = arith.constant 0 : index
    %c0_13 = arith.constant 0 : index
    %8 = vector.load %arg3[%c0_11, %c0_12, %c0_13] : memref<1x8x1xf32, #tpu.memory_space<vmem>>, vector<1x8x1xf32>
    %c0_14 = arith.constant 0 : index
    %c0_15 = arith.constant 0 : index
    %c0_16 = arith.constant 0 : index
    %9 = vector.load %arg4[%c0_14, %c0_15, %c0_16] : memref<1x8x1xf32, #tpu.memory_space<vmem>>, vector<1x8x1xf32>
    %c0_17 = arith.constant 0 : index
    %c0_18 = arith.constant 0 : index
    %c111 = arith.constant 111 : index
    %10 = vector.load %arg9[%c0_17, %c0_18, %c111] : memref<2x8x512xf32, #tpu.memory_space<vmem>>, vector<1x8x256xf32>
    %11 = vector.shape_cast %10 : vector<1x8x256xf32> to vector<8x256xf32>
    %12 = vector.broadcast %1 : vector<1x256xf32> to vector<8x256xf32>
    %13 = arith.mulf %11, %12 : vector<8x256xf32>
    %c0_19 = arith.constant 0 : index
    %c0_20 = arith.constant 0 : index
    %c112 = arith.constant 112 : index
    %14 = vector.load %arg9[%c0_19, %c0_20, %c112] : memref<2x8x512xf32, #tpu.memory_space<vmem>>, vector<1x8x256xf32>
    %15 = vector.shape_cast %14 : vector<1x8x256xf32> to vector<8x256xf32>
    %c0_21 = arith.constant 0 : index
    %c0_22 = arith.constant 0 : index
    %c113 = arith.constant 113 : index
    %16 = vector.load %arg9[%c0_21, %c0_22, %c113] : memref<2x8x512xf32, #tpu.memory_space<vmem>>, vector<1x8x256xf32>
    %17 = vector.shape_cast %16 : vector<1x8x256xf32> to vector<8x256xf32>
    %18 = vector.broadcast %2 : vector<1x256xf32> to vector<8x256xf32>
    %19 = arith.mulf %17, %18 : vector<8x256xf32>
    %c0_23 = arith.constant 0 : index
    %c0_24 = arith.constant 0 : index
    %c127 = arith.constant 127 : index
    %20 = vector.load %arg9[%c0_23, %c0_24, %c127] : memref<2x8x512xf32, #tpu.memory_space<vmem>>, vector<1x8x256xf32>
    %21 = vector.shape_cast %20 : vector<1x8x256xf32> to vector<8x256xf32>
    %22 = vector.broadcast %1 : vector<1x256xf32> to vector<8x256xf32>
    %23 = arith.mulf %21, %22 : vector<8x256xf32>
    %c0_25 = arith.constant 0 : index
    %c0_26 = arith.constant 0 : index
    %c128_27 = arith.constant 128 : index
    %24 = vector.load %arg9[%c0_25, %c0_26, %c128_27] : memref<2x8x512xf32, #tpu.memory_space<vmem>>, vector<1x8x256xf32>
    %25 = vector.shape_cast %24 : vector<1x8x256xf32> to vector<8x256xf32>
    %c0_28 = arith.constant 0 : index
    %c0_29 = arith.constant 0 : index
    %c129 = arith.constant 129 : index
    %26 = vector.load %arg9[%c0_28, %c0_29, %c129] : memref<2x8x512xf32, #tpu.memory_space<vmem>>, vector<1x8x256xf32>
    %27 = vector.shape_cast %26 : vector<1x8x256xf32> to vector<8x256xf32>
    %28 = vector.broadcast %2 : vector<1x256xf32> to vector<8x256xf32>
    %29 = arith.mulf %27, %28 : vector<8x256xf32>
    %c0_30 = arith.constant 0 : index
    %c0_31 = arith.constant 0 : index
    %c143 = arith.constant 143 : index
    %30 = vector.load %arg9[%c0_30, %c0_31, %c143] : memref<2x8x512xf32, #tpu.memory_space<vmem>>, vector<1x8x256xf32>
    %31 = vector.shape_cast %30 : vector<1x8x256xf32> to vector<8x256xf32>
    %32 = vector.broadcast %1 : vector<1x256xf32> to vector<8x256xf32>
    %33 = arith.mulf %31, %32 : vector<8x256xf32>
    %c0_32 = arith.constant 0 : index
    %c0_33 = arith.constant 0 : index
    %c144 = arith.constant 144 : index
    %34 = vector.load %arg9[%c0_32, %c0_33, %c144] : memref<2x8x512xf32, #tpu.memory_space<vmem>>, vector<1x8x256xf32>
    %35 = vector.shape_cast %34 : vector<1x8x256xf32> to vector<8x256xf32>
    %c0_34 = arith.constant 0 : index
    %c0_35 = arith.constant 0 : index
    %c145 = arith.constant 145 : index
    %36 = vector.load %arg9[%c0_34, %c0_35, %c145] : memref<2x8x512xf32, #tpu.memory_space<vmem>>, vector<1x8x256xf32>
    %37 = vector.shape_cast %36 : vector<1x8x256xf32> to vector<8x256xf32>
    %38 = vector.broadcast %2 : vector<1x256xf32> to vector<8x256xf32>
    %39 = arith.mulf %37, %38 : vector<8x256xf32>
    %40 = tpu.concatenate %13, %15, %19, %23, %25, %29, %33, %35, %39 in 0 : vector<8x256xf32>, vector<8x256xf32>, vector<8x256xf32>, vector<8x256xf32>, vector<8x256xf32>, vector<8x256xf32>, vector<8x256xf32>, vector<8x256xf32>, vector<8x256xf32> -> vector<72x256xf32>
    %cst_36 = arith.constant dense<0.000000e+00> : vector<8x256xf32>
    %41 = tpu.matmul %7, %40, %cst_36 {dimension_numbers = #tpu.dot_dimension_numbers<[1], [0], [0], [1], [0, 0, 1, 1], [], []>} : vector<8x72xf32>, vector<72x256xf32>, vector<8x256xf32> -> vector<8x256xf32>
    %c1 = arith.constant 1 : index
    %c0_37 = arith.constant 0 : index
    %c111_38 = arith.constant 111 : index
    %42 = vector.load %arg9[%c1, %c0_37, %c111_38] : memref<2x8x512xf32, #tpu.memory_space<vmem>>, vector<1x8x256xf32>
    %43 = vector.shape_cast %42 : vector<1x8x256xf32> to vector<8x256xf32>
    %44 = vector.broadcast %1 : vector<1x256xf32> to vector<8x256xf32>
    %45 = arith.mulf %43, %44 : vector<8x256xf32>
    %c1_39 = arith.constant 1 : index
    %c0_40 = arith.constant 0 : index
    %c112_41 = arith.constant 112 : index
    %46 = vector.load %arg9[%c1_39, %c0_40, %c112_41] : memref<2x8x512xf32, #tpu.memory_space<vmem>>, vector<1x8x256xf32>
    %47 = vector.shape_cast %46 : vector<1x8x256xf32> to vector<8x256xf32>
    %c1_42 = arith.constant 1 : index
    %c0_43 = arith.constant 0 : index
    %c113_44 = arith.constant 113 : index
    %48 = vector.load %arg9[%c1_42, %c0_43, %c113_44] : memref<2x8x512xf32, #tpu.memory_space<vmem>>, vector<1x8x256xf32>
    %49 = vector.shape_cast %48 : vector<1x8x256xf32> to vector<8x256xf32>
    %50 = vector.broadcast %2 : vector<1x256xf32> to vector<8x256xf32>
    %51 = arith.mulf %49, %50 : vector<8x256xf32>
    %c1_45 = arith.constant 1 : index
    %c0_46 = arith.constant 0 : index
    %c127_47 = arith.constant 127 : index
    %52 = vector.load %arg9[%c1_45, %c0_46, %c127_47] : memref<2x8x512xf32, #tpu.memory_space<vmem>>, vector<1x8x256xf32>
    %53 = vector.shape_cast %52 : vector<1x8x256xf32> to vector<8x256xf32>
    %54 = vector.broadcast %1 : vector<1x256xf32> to vector<8x256xf32>
    %55 = arith.mulf %53, %54 : vector<8x256xf32>
    %c1_48 = arith.constant 1 : index
    %c0_49 = arith.constant 0 : index
    %c128_50 = arith.constant 128 : index
    %56 = vector.load %arg9[%c1_48, %c0_49, %c128_50] : memref<2x8x512xf32, #tpu.memory_space<vmem>>, vector<1x8x256xf32>
    %57 = vector.shape_cast %56 : vector<1x8x256xf32> to vector<8x256xf32>
    %c1_51 = arith.constant 1 : index
    %c0_52 = arith.constant 0 : index
    %c129_53 = arith.constant 129 : index
    %58 = vector.load %arg9[%c1_51, %c0_52, %c129_53] : memref<2x8x512xf32, #tpu.memory_space<vmem>>, vector<1x8x256xf32>
    %59 = vector.shape_cast %58 : vector<1x8x256xf32> to vector<8x256xf32>
    %60 = vector.broadcast %2 : vector<1x256xf32> to vector<8x256xf32>
    %61 = arith.mulf %59, %60 : vector<8x256xf32>
    %c1_54 = arith.constant 1 : index
    %c0_55 = arith.constant 0 : index
    %c143_56 = arith.constant 143 : index
    %62 = vector.load %arg9[%c1_54, %c0_55, %c143_56] : memref<2x8x512xf32, #tpu.memory_space<vmem>>, vector<1x8x256xf32>
    %63 = vector.shape_cast %62 : vector<1x8x256xf32> to vector<8x256xf32>
    %64 = vector.broadcast %1 : vector<1x256xf32> to vector<8x256xf32>
    %65 = arith.mulf %63, %64 : vector<8x256xf32>
    %c1_57 = arith.constant 1 : index
    %c0_58 = arith.constant 0 : index
    %c144_59 = arith.constant 144 : index
    %66 = vector.load %arg9[%c1_57, %c0_58, %c144_59] : memref<2x8x512xf32, #tpu.memory_space<vmem>>, vector<1x8x256xf32>
    %67 = vector.shape_cast %66 : vector<1x8x256xf32> to vector<8x256xf32>
    %c1_60 = arith.constant 1 : index
    %c0_61 = arith.constant 0 : index
    %c145_62 = arith.constant 145 : index
    %68 = vector.load %arg9[%c1_60, %c0_61, %c145_62] : memref<2x8x512xf32, #tpu.memory_space<vmem>>, vector<1x8x256xf32>
    %69 = vector.shape_cast %68 : vector<1x8x256xf32> to vector<8x256xf32>
    %70 = vector.broadcast %2 : vector<1x256xf32> to vector<8x256xf32>
    %71 = arith.mulf %69, %70 : vector<8x256xf32>
    %72 = tpu.concatenate %45, %47, %51, %55, %57, %61, %65, %67, %71 in 0 : vector<8x256xf32>, vector<8x256xf32>, vector<8x256xf32>, vector<8x256xf32>, vector<8x256xf32>, vector<8x256xf32>, vector<8x256xf32>, vector<8x256xf32>, vector<8x256xf32> -> vector<72x256xf32>
    %cst_63 = arith.constant dense<0.000000e+00> : vector<8x256xf32>
    %73 = tpu.matmul %7, %72, %cst_63 {dimension_numbers = #tpu.dot_dimension_numbers<[1], [0], [0], [1], [0, 0, 1, 1], [], []>} : vector<8x72xf32>, vector<72x256xf32>, vector<8x256xf32> -> vector<8x256xf32>
    %74 = vector.shape_cast %41 : vector<8x256xf32> to vector<1x8x256xf32>
    %75 = vector.shape_cast %73 : vector<8x256xf32> to vector<1x8x256xf32>
    %76 = tpu.concatenate %74, %75 in 0 : vector<1x8x256xf32>, vector<1x8x256xf32> -> vector<2x8x256xf32>
    %cst_64 = arith.constant dense<0.000000e+00> : vector<2x8xf32>
    %77 = vector.multi_reduction <add>, %76, %cst_64 [2] : vector<2x8x256xf32> to vector<2x8xf32>
    %78 = vector.shape_cast %77 : vector<2x8xf32> to vector<2x8x1xf32>
    %cst_65 = arith.constant dense<0.000000e+00> : vector<8x1xf32>
    %79 = vector.multi_reduction <add>, %78, %cst_65 [0] : vector<2x8x1xf32> to vector<8x1xf32>
    %80 = vector.shape_cast %79 : vector<8x1xf32> to vector<1x8x1xf32>
    %cst_66 = arith.constant 5.120000e+02 : f32
    %81 = vector.broadcast %cst_66 : f32 to vector<1x8x1xf32>
    %82 = arith.divf %80, %81 : vector<1x8x1xf32>
    %83 = vector.broadcast %82 : vector<1x8x1xf32> to vector<2x8x256xf32>
    %84 = arith.subf %76, %83 : vector<2x8x256xf32>
    %85 = arith.mulf %84, %84 : vector<2x8x256xf32>
    %cst_67 = arith.constant dense<0.000000e+00> : vector<2x8xf32>
    %86 = vector.multi_reduction <add>, %85, %cst_67 [2] : vector<2x8x256xf32> to vector<2x8xf32>
    %87 = vector.shape_cast %86 : vector<2x8xf32> to vector<2x8x1xf32>
    %cst_68 = arith.constant dense<0.000000e+00> : vector<8x1xf32>
    %88 = vector.multi_reduction <add>, %87, %cst_68 [0] : vector<2x8x1xf32> to vector<8x1xf32>
    %89 = vector.shape_cast %88 : vector<8x1xf32> to vector<1x8x1xf32>
    %cst_69 = arith.constant 5.120000e+02 : f32
    %90 = vector.broadcast %cst_69 : f32 to vector<1x8x1xf32>
    %91 = arith.divf %89, %90 : vector<1x8x1xf32>
    %cst_70 = arith.constant 9.99999974E-6 : f32
    %92 = vector.broadcast %cst_70 : f32 to vector<1x8x1xf32>
    %93 = arith.addf %91, %92 : vector<1x8x1xf32>
    %94 = math.rsqrt %93 : vector<1x8x1xf32>
    %95 = arith.mulf %8, %94 : vector<1x8x1xf32>
    %96 = vector.broadcast %95 : vector<1x8x1xf32> to vector<2x8x256xf32>
    %97 = arith.mulf %84, %96 : vector<2x8x256xf32>
    %98 = vector.broadcast %9 : vector<1x8x1xf32> to vector<2x8x256xf32>
    %99 = arith.addf %97, %98 : vector<2x8x256xf32>
    %cst_71 = arith.constant 0.000000e+00 : f32
    %100 = vector.broadcast %cst_71 : f32 to vector<2x8x256xf32>
    %101 = arith.maximumf %99, %100 : vector<2x8x256xf32>
    %cst_72 = arith.constant 0.000000e+00 : f32
    %102 = vector.broadcast %cst_72 : f32 to vector<2x8x512xf32>
    %c0_73 = arith.constant 0 : index
    %c0_74 = arith.constant 0 : index
    %c0_75 = arith.constant 0 : index
    %103 = vector.load %arg10[%c0_73, %c0_74, %c0_75] : memref<2x8x512xf32, #tpu.memory_space<vmem>>, vector<2x8x512xf32>
    tpu.vector_store %arg10[%c0_73, %c0_74, %c0_75], %102 {strides = array<i32>} : memref<2x8x512xf32, #tpu.memory_space<vmem>>, vector<2x8x512xf32>,
    %c0_76 = arith.constant 0 : index
    %c0_77 = arith.constant 0 : index
    %c128_78 = arith.constant 128 : index
    %104 = vector.load %arg10[%c0_76, %c0_77, %c128_78] : memref<2x8x512xf32, #tpu.memory_space<vmem>>, vector<2x8x256xf32>
    tpu.vector_store %arg10[%c0_76, %c0_77, %c128_78], %101 {strides = array<i32>} : memref<2x8x512xf32, #tpu.memory_space<vmem>>, vector<2x8x256xf32>,
    %c0_79 = arith.constant 0 : index
    %c0_80 = arith.constant 0 : index
    %105 = vector.load %arg5[%c0_79, %c0_80] : memref<8x72xf32, #tpu.memory_space<vmem>>, vector<8x72xf32>
    %c0_81 = arith.constant 0 : index
    %c0_82 = arith.constant 0 : index
    %c0_83 = arith.constant 0 : index
    %106 = vector.load %arg6[%c0_81, %c0_82, %c0_83] : memref<1x8x1xf32, #tpu.memory_space<vmem>>, vector<1x8x1xf32>
    %c0_84 = arith.constant 0 : index
    %c0_85 = arith.constant 0 : index
    %c0_86 = arith.constant 0 : index
    %107 = vector.load %arg7[%c0_84, %c0_85, %c0_86] : memref<1x8x1xf32, #tpu.memory_space<vmem>>, vector<1x8x1xf32>
    %c0_87 = arith.constant 0 : index
    %c0_88 = arith.constant 0 : index
    %c111_89 = arith.constant 111 : index
    %108 = vector.load %arg10[%c0_87, %c0_88, %c111_89] : memref<2x8x512xf32, #tpu.memory_space<vmem>>, vector<1x8x256xf32>
    %109 = vector.shape_cast %108 : vector<1x8x256xf32> to vector<8x256xf32>
    %110 = vector.broadcast %1 : vector<1x256xf32> to vector<8x256xf32>
    %111 = arith.mulf %109, %110 : vector<8x256xf32>
    %c0_90 = arith.constant 0 : index
    %c0_91 = arith.constant 0 : index
    %c112_92 = arith.constant 112 : index
    %112 = vector.load %arg10[%c0_90, %c0_91, %c112_92] : memref<2x8x512xf32, #tpu.memory_space<vmem>>, vector<1x8x256xf32>
    %113 = vector.shape_cast %112 : vector<1x8x256xf32> to vector<8x256xf32>
    %c0_93 = arith.constant 0 : index
    %c0_94 = arith.constant 0 : index
    %c113_95 = arith.constant 113 : index
    %114 = vector.load %arg10[%c0_93, %c0_94, %c113_95] : memref<2x8x512xf32, #tpu.memory_space<vmem>>, vector<1x8x256xf32>
    %115 = vector.shape_cast %114 : vector<1x8x256xf32> to vector<8x256xf32>
    %116 = vector.broadcast %2 : vector<1x256xf32> to vector<8x256xf32>
    %117 = arith.mulf %115, %116 : vector<8x256xf32>
    %c0_96 = arith.constant 0 : index
    %c0_97 = arith.constant 0 : index
    %c127_98 = arith.constant 127 : index
    %118 = vector.load %arg10[%c0_96, %c0_97, %c127_98] : memref<2x8x512xf32, #tpu.memory_space<vmem>>, vector<1x8x256xf32>
    %119 = vector.shape_cast %118 : vector<1x8x256xf32> to vector<8x256xf32>
    %120 = vector.broadcast %1 : vector<1x256xf32> to vector<8x256xf32>
    %121 = arith.mulf %119, %120 : vector<8x256xf32>
    %c0_99 = arith.constant 0 : index
    %c0_100 = arith.constant 0 : index
    %c128_101 = arith.constant 128 : index
    %122 = vector.load %arg10[%c0_99, %c0_100, %c128_101] : memref<2x8x512xf32, #tpu.memory_space<vmem>>, vector<1x8x256xf32>
    %123 = vector.shape_cast %122 : vector<1x8x256xf32> to vector<8x256xf32>
    %c0_102 = arith.constant 0 : index
    %c0_103 = arith.constant 0 : index
    %c129_104 = arith.constant 129 : index
    %124 = vector.load %arg10[%c0_102, %c0_103, %c129_104] : memref<2x8x512xf32, #tpu.memory_space<vmem>>, vector<1x8x256xf32>
    %125 = vector.shape_cast %124 : vector<1x8x256xf32> to vector<8x256xf32>
    %126 = vector.broadcast %2 : vector<1x256xf32> to vector<8x256xf32>
    %127 = arith.mulf %125, %126 : vector<8x256xf32>
    %c0_105 = arith.constant 0 : index
    %c0_106 = arith.constant 0 : index
    %c143_107 = arith.constant 143 : index
    %128 = vector.load %arg10[%c0_105, %c0_106, %c143_107] : memref<2x8x512xf32, #tpu.memory_space<vmem>>, vector<1x8x256xf32>
    %129 = vector.shape_cast %128 : vector<1x8x256xf32> to vector<8x256xf32>
    %130 = vector.broadcast %1 : vector<1x256xf32> to vector<8x256xf32>
    %131 = arith.mulf %129, %130 : vector<8x256xf32>
    %c0_108 = arith.constant 0 : index
    %c0_109 = arith.constant 0 : index
    %c144_110 = arith.constant 144 : index
    %132 = vector.load %arg10[%c0_108, %c0_109, %c144_110] : memref<2x8x512xf32, #tpu.memory_space<vmem>>, vector<1x8x256xf32>
    %133 = vector.shape_cast %132 : vector<1x8x256xf32> to vector<8x256xf32>
    %c0_111 = arith.constant 0 : index
    %c0_112 = arith.constant 0 : index
    %c145_113 = arith.constant 145 : index
    %134 = vector.load %arg10[%c0_111, %c0_112, %c145_113] : memref<2x8x512xf32, #tpu.memory_space<vmem>>, vector<1x8x256xf32>
    %135 = vector.shape_cast %134 : vector<1x8x256xf32> to vector<8x256xf32>
    %136 = vector.broadcast %2 : vector<1x256xf32> to vector<8x256xf32>
    %137 = arith.mulf %135, %136 : vector<8x256xf32>
    %138 = tpu.concatenate %111, %113, %117, %121, %123, %127, %131, %133, %137 in 0 : vector<8x256xf32>, vector<8x256xf32>, vector<8x256xf32>, vector<8x256xf32>, vector<8x256xf32>, vector<8x256xf32>, vector<8x256xf32>, vector<8x256xf32>, vector<8x256xf32> -> vector<72x256xf32>
    %cst_114 = arith.constant dense<0.000000e+00> : vector<8x256xf32>
    %139 = tpu.matmul %105, %138, %cst_114 {dimension_numbers = #tpu.dot_dimension_numbers<[1], [0], [0], [1], [0, 0, 1, 1], [], []>} : vector<8x72xf32>, vector<72x256xf32>, vector<8x256xf32> -> vector<8x256xf32>
    %c1_115 = arith.constant 1 : index
    %c0_116 = arith.constant 0 : index
    %c111_117 = arith.constant 111 : index
    %140 = vector.load %arg10[%c1_115, %c0_116, %c111_117] : memref<2x8x512xf32, #tpu.memory_space<vmem>>, vector<1x8x256xf32>
    %141 = vector.shape_cast %140 : vector<1x8x256xf32> to vector<8x256xf32>
    %142 = vector.broadcast %1 : vector<1x256xf32> to vector<8x256xf32>
    %143 = arith.mulf %141, %142 : vector<8x256xf32>
    %c1_118 = arith.constant 1 : index
    %c0_119 = arith.constant 0 : index
    %c112_120 = arith.constant 112 : index
    %144 = vector.load %arg10[%c1_118, %c0_119, %c112_120] : memref<2x8x512xf32, #tpu.memory_space<vmem>>, vector<1x8x256xf32>
    %145 = vector.shape_cast %144 : vector<1x8x256xf32> to vector<8x256xf32>
    %c1_121 = arith.constant 1 : index
    %c0_122 = arith.constant 0 : index
    %c113_123 = arith.constant 113 : index
    %146 = vector.load %arg10[%c1_121, %c0_122, %c113_123] : memref<2x8x512xf32, #tpu.memory_space<vmem>>, vector<1x8x256xf32>
    %147 = vector.shape_cast %146 : vector<1x8x256xf32> to vector<8x256xf32>
    %148 = vector.broadcast %2 : vector<1x256xf32> to vector<8x256xf32>
    %149 = arith.mulf %147, %148 : vector<8x256xf32>
    %c1_124 = arith.constant 1 : index
    %c0_125 = arith.constant 0 : index
    %c127_126 = arith.constant 127 : index
    %150 = vector.load %arg10[%c1_124, %c0_125, %c127_126] : memref<2x8x512xf32, #tpu.memory_space<vmem>>, vector<1x8x256xf32>
    %151 = vector.shape_cast %150 : vector<1x8x256xf32> to vector<8x256xf32>
    %152 = vector.broadcast %1 : vector<1x256xf32> to vector<8x256xf32>
    %153 = arith.mulf %151, %152 : vector<8x256xf32>
    %c1_127 = arith.constant 1 : index
    %c0_128 = arith.constant 0 : index
    %c128_129 = arith.constant 128 : index
    %154 = vector.load %arg10[%c1_127, %c0_128, %c128_129] : memref<2x8x512xf32, #tpu.memory_space<vmem>>, vector<1x8x256xf32>
    %155 = vector.shape_cast %154 : vector<1x8x256xf32> to vector<8x256xf32>
    %c1_130 = arith.constant 1 : index
    %c0_131 = arith.constant 0 : index
    %c129_132 = arith.constant 129 : index
    %156 = vector.load %arg10[%c1_130, %c0_131, %c129_132] : memref<2x8x512xf32, #tpu.memory_space<vmem>>, vector<1x8x256xf32>
    %157 = vector.shape_cast %156 : vector<1x8x256xf32> to vector<8x256xf32>
    %158 = vector.broadcast %2 : vector<1x256xf32> to vector<8x256xf32>
    %159 = arith.mulf %157, %158 : vector<8x256xf32>
    %c1_133 = arith.constant 1 : index
    %c0_134 = arith.constant 0 : index
    %c143_135 = arith.constant 143 : index
    %160 = vector.load %arg10[%c1_133, %c0_134, %c143_135] : memref<2x8x512xf32, #tpu.memory_space<vmem>>, vector<1x8x256xf32>
    %161 = vector.shape_cast %160 : vector<1x8x256xf32> to vector<8x256xf32>
    %162 = vector.broadcast %1 : vector<1x256xf32> to vector<8x256xf32>
    %163 = arith.mulf %161, %162 : vector<8x256xf32>
    %c1_136 = arith.constant 1 : index
    %c0_137 = arith.constant 0 : index
    %c144_138 = arith.constant 144 : index
    %164 = vector.load %arg10[%c1_136, %c0_137, %c144_138] : memref<2x8x512xf32, #tpu.memory_space<vmem>>, vector<1x8x256xf32>
    %165 = vector.shape_cast %164 : vector<1x8x256xf32> to vector<8x256xf32>
    %c1_139 = arith.constant 1 : index
    %c0_140 = arith.constant 0 : index
    %c145_141 = arith.constant 145 : index
    %166 = vector.load %arg10[%c1_139, %c0_140, %c145_141] : memref<2x8x512xf32, #tpu.memory_space<vmem>>, vector<1x8x256xf32>
    %167 = vector.shape_cast %166 : vector<1x8x256xf32> to vector<8x256xf32>
    %168 = vector.broadcast %2 : vector<1x256xf32> to vector<8x256xf32>
    %169 = arith.mulf %167, %168 : vector<8x256xf32>
    %170 = tpu.concatenate %143, %145, %149, %153, %155, %159, %163, %165, %169 in 0 : vector<8x256xf32>, vector<8x256xf32>, vector<8x256xf32>, vector<8x256xf32>, vector<8x256xf32>, vector<8x256xf32>, vector<8x256xf32>, vector<8x256xf32>, vector<8x256xf32> -> vector<72x256xf32>
    %cst_142 = arith.constant dense<0.000000e+00> : vector<8x256xf32>
    %171 = tpu.matmul %105, %170, %cst_142 {dimension_numbers = #tpu.dot_dimension_numbers<[1], [0], [0], [1], [0, 0, 1, 1], [], []>} : vector<8x72xf32>, vector<72x256xf32>, vector<8x256xf32> -> vector<8x256xf32>
    %172 = vector.shape_cast %139 : vector<8x256xf32> to vector<1x8x256xf32>
    %173 = vector.shape_cast %171 : vector<8x256xf32> to vector<1x8x256xf32>
    %174 = tpu.concatenate %172, %173 in 0 : vector<1x8x256xf32>, vector<1x8x256xf32> -> vector<2x8x256xf32>
    %cst_143 = arith.constant dense<0.000000e+00> : vector<2x8xf32>
    %175 = vector.multi_reduction <add>, %174, %cst_143 [2] : vector<2x8x256xf32> to vector<2x8xf32>
    %176 = vector.shape_cast %175 : vector<2x8xf32> to vector<2x8x1xf32>
    %cst_144 = arith.constant dense<0.000000e+00> : vector<8x1xf32>
    %177 = vector.multi_reduction <add>, %176, %cst_144 [0] : vector<2x8x1xf32> to vector<8x1xf32>
    %178 = vector.shape_cast %177 : vector<8x1xf32> to vector<1x8x1xf32>
    %cst_145 = arith.constant 5.120000e+02 : f32
    %179 = vector.broadcast %cst_145 : f32 to vector<1x8x1xf32>
    %180 = arith.divf %178, %179 : vector<1x8x1xf32>
    %181 = vector.broadcast %180 : vector<1x8x1xf32> to vector<2x8x256xf32>
    %182 = arith.subf %174, %181 : vector<2x8x256xf32>
    %183 = arith.mulf %182, %182 : vector<2x8x256xf32>
    %cst_146 = arith.constant dense<0.000000e+00> : vector<2x8xf32>
    %184 = vector.multi_reduction <add>, %183, %cst_146 [2] : vector<2x8x256xf32> to vector<2x8xf32>
    %185 = vector.shape_cast %184 : vector<2x8xf32> to vector<2x8x1xf32>
    %cst_147 = arith.constant dense<0.000000e+00> : vector<8x1xf32>
    %186 = vector.multi_reduction <add>, %185, %cst_147 [0] : vector<2x8x1xf32> to vector<8x1xf32>
    %187 = vector.shape_cast %186 : vector<8x1xf32> to vector<1x8x1xf32>
    %cst_148 = arith.constant 5.120000e+02 : f32
    %188 = vector.broadcast %cst_148 : f32 to vector<1x8x1xf32>
    %189 = arith.divf %187, %188 : vector<1x8x1xf32>
    %cst_149 = arith.constant 9.99999974E-6 : f32
    %190 = vector.broadcast %cst_149 : f32 to vector<1x8x1xf32>
    %191 = arith.addf %189, %190 : vector<1x8x1xf32>
    %192 = math.rsqrt %191 : vector<1x8x1xf32>
    %193 = arith.mulf %106, %192 : vector<1x8x1xf32>
    %194 = vector.broadcast %193 : vector<1x8x1xf32> to vector<2x8x256xf32>
    %195 = arith.mulf %182, %194 : vector<2x8x256xf32>
    %196 = vector.broadcast %107 : vector<1x8x1xf32> to vector<2x8x256xf32>
    %197 = arith.addf %195, %196 : vector<2x8x256xf32>
    %cst_150 = arith.constant 0.000000e+00 : f32
    %198 = vector.broadcast %cst_150 : f32 to vector<2x8x256xf32>
    %199 = arith.maximumf %197, %198 : vector<2x8x256xf32>
    %c0_151 = arith.constant 0 : index
    %c0_152 = arith.constant 0 : index
    %c0_153 = arith.constant 0 : index
    %200 = vector.load %arg8[%c0_151, %c0_152, %c0_153] : memref<2x8x256xf32, #tpu.memory_space<vmem>>, vector<2x8x256xf32>
    tpu.vector_store %arg8[%c0_151, %c0_152, %c0_153], %199 {strides = array<i32>} : memref<2x8x256xf32, #tpu.memory_space<vmem>>, vector<2x8x256xf32>,
    return
  }
}

</mosaic_0001>

<bundles_post_ra>
// kernel: conv_block_forward.1
= control target key start
LH: loop header
LB: loop body
LE: loop exit
PB: predicated region body
PF: predicated region fallthrough
CT: control target
= control target key end

     0   :  { %v53_v0 = vlaneseq  ;;  %v1873_v1 = vmov 0.0   ;;  %s1874_s29 = smov 113   ;;  %s1875_s30 = smov 127   ;;  %vm109_vm0 = vcmask 924672   ;;  %vm121_vm1 = vcmask 1039360   ;;  %s2556_s1 = inlined_call_operand.vmem [shape: f32[2,256], index: 1, kind: input, shape index: {}]   ;;  %s2557_s0 = inlined_call_operand.vmem [shape: f32[2,8,256], index: 0, kind: input, shape index: {}]   ;;  %s2558_s2 = inlined_call_operand.vmem [shape: f32[8,72], index: 2, kind: input, shape index: {}]   ;;  %s2559_s4 = inlined_call_operand.vmem [shape: f32[1,8,1], index: 4, kind: input, shape index: {}]   ;;  %s2560_s3 = inlined_call_operand.vmem [shape: f32[1,8,1], index: 3, kind: input, shape index: {}]   ;;  %s2561_s5 = inlined_call_operand.vmem [shape: f32[8,72], index: 5, kind: input, shape index: {}]   ;;  %s2562_s7 = inlined_call_operand.vmem [shape: f32[1,8,1], index: 7, kind: input, shape index: {}]   ;;  %s2563_s6 = inlined_call_operand.vmem [shape: f32[1,8,1], index: 6, kind: input, shape index: {}]   ;;  %s2564_s8 = inlined_call_operand.vmem [shape: f32[2,8,256], index: 8, kind: output, shape index: {}]  }
   0x1   :  { %680 = vmatprep.mubr.f32.mxu1 %v1873_v1  ;;  %413 = vmatprep.mubr.f32.mxu0 %v1873_v1  ;;  %v29_v3 = vld [vmem:[%s2556_s1] sm:$0xf]  ;;  %s1876_s1 = smov 1   ;;  %s1877_s9 = smov 15   ;;  %v1949_v17 = vld [vmem:[%s2557_s0 + $0x8] sm:$0xff]  ;;  %v1954_v18 = vld [vmem:[%s2557_s0 + $0x10] sm:$0xff] }
   0x2   :  { %v54_v2 = vshrl.u32 %v53_v0, 7  ;;  %s1878_s10 = smov 17   ;;  %v1944_v16 = vld [vmem:[%s2557_s0] sm:$0xff]  ;;  %v1959_v19 = vld [vmem:[%s2557_s0 + $0x18] sm:$0xff]  ;;  %s1879_s19 = smov 111   ;;  %v1457_v22 = vpack.i.bf16 %v1954_v18, %v1873_v1  ;;  %vm134_vm2 = vcmask 7168  }
   0x3   :  { %v1427_v20 = vpack.i.bf16 %v1949_v17, %v1944_v16  ;;  %v1432_v21 = vpack.i.bf16 %v1959_v19, %v1954_v18  ;;  %s1880_s0 = smov 95   ;;  %v1462_v23 = vpack.i.bf16 %v1873_v1, %v1959_v19  ;;  %s1881_s20 = smov 126   ;;  %vm146_vm3 = vcmask 121856  }
   0x4   :  { %v87_v4 = vsub.s32 1, %v54_v2  ;;  %v55_v5 = vsub.s32 0, %v54_v2  ;;  %v91_v6 = vsub.s32 3, %v54_v2  ;;  %v59_v7 = vsub.s32 2, %v54_v2  ;;  %s1882_s21 = smov 112   ;;  %s1883_s22 = smov 110  }
   0x5   :  { %s1884_s23 = smov 96   ;;  %s1885_s24 = smov 94   ;;  %vm158_vm4 = vcmask 138240   ;;  %vm77_vm5 = vcmask 908288   ;;  %vm237_vm6 = vcmask 777216   ;;  %vm198_vm7 = vcmask 916480  }
   0x6   :  { %v88_v8 = vrot.slane %v29_v3, %v87_v4  ;;  %v56_v9 = vrot.slane %v29_v3, %v55_v5  ;;  %v92_v10 = vrot.slane %v29_v3, %v91_v6  ;;  %v60_v11 = vrot.slane %v29_v3, %v59_v7 }
   0x7   :  { %vm186_vm8 = vcmask 1031168   ;;  %vm215_vm9 = vcmask 900096   ;;  %vm249_vm10 = vcmask 769024   ;;  %vm227_vm11 = vcmask 785408  }
   0x8   :  { %v98_v12 = vrot.slane %v88_v8, %v87_v4  ;;  %v66_v13 = vrot.slane %v56_v9, %v55_v5  ;;  %v102_v14 = vrot.slane %v92_v10, %v87_v4  ;;  %v70_v15 = vrot.slane %v60_v11, %v55_v5 }
   0x9   :  { %vm345_vm12 = vcmask 588800  }
   0xa   :  { %105 = vrot.lane.b32.xlu0 %v98_v12, %s1874_s29  ;;  %117 = vrot.lane.b32.xlu1 %v66_v13, %s1875_s30 }
   0xe   :  { %107 = vrot.lane.b32.xlu0 %v102_v14, %s1874_s29  ;;  %119 = vrot.lane.b32.xlu1 %v70_v15, %s1875_s30 }
  0x12   :  { %130 = vrot.lane.b32.xlu0 %v98_v12, %s1876_s1  ;;  %132 = vrot.lane.b32.xlu1 %v102_v14, %s1876_s1 }
  0x16   :  { %142 = vrot.lane.b32.xlu0 %v66_v13, %s1877_s9  ;;  %144 = vrot.lane.b32.xlu1 %v70_v15, %s1877_s9 }
  0x1a   :  { %154 = vrot.lane.b32.xlu0 %v98_v12, %s1878_s10  ;;  %156 = vrot.lane.b32.xlu1 %v102_v14, %s1878_s10 }
  0x1e   :  { %73 = vrot.lane.b32.xlu0 %v66_v13, %s1879_s19  ;;  %75 = vrot.lane.b32.xlu1 %v70_v15, %s1879_s19 }
  0x22   :  { %1428 = vrot.lane.b32.xlu0 %v1427_v20, %s1875_s30  ;;  %1433 = vrot.lane.b32.xlu1 %v1432_v21, %s1875_s30 }
  0x26   :  { %1438 = vrot.lane.b32.xlu0 %v1873_v1, %s1875_s30  ;;  %1443 = vrot.lane.b32.xlu1 %v1427_v20, %s1879_s19 }
  0x2a   :  { %1448 = vrot.lane.b32.xlu0 %v1432_v21, %s1879_s19  ;;  %1458 = vrot.lane.b32.xlu1 %v1457_v22, %s1880_s0 }
  0x2e   :  { %1463 = vrot.lane.b32.xlu1 %v1462_v23, %s1880_s0  ;;  %1453 = vrot.lane.b32.xlu0 %v1427_v20, %s1880_s0 }
  0x7c   :  { %v106_v24 = vpop.permute.xlu0 %105  ;;  %v118_v25 = vpop.permute.xlu1 %117 }
  0x7d   :  { %v114_v26 = vmul.f32 0.0, %v106_v24  ;;  %v126_v27 = vmul.f32 0.0, %v118_v25 }
  0x7f   :  { %v1980_v28 = vpack.i.bf16 %v114_v26, %v114_v26  ;;  %v1982_v29 = vpack.i.bf16 %v126_v27, %v126_v27 }
  0x80   :  { %v1984_v30 = vpop.permute.xlu0 %107  ;;  %v1986_v31 = vpop.permute.xlu1 %119 }
  0x81   :  { %1468 = vrot.lane.b32.xlu1 %v1980_v28, %s1881_s20  ;;  %1473 = vrot.lane.b32.xlu0 %v1982_v29, %s1882_s21  ;;  %v2002_v39 = vsel %vm109_vm0, %v106_v24, %v1984_v30  ;;  %v2011_v42 = vsel %vm121_vm1, %v118_v25, %v1986_v31  ;;  %v116_v45 = vmul.f32 %v1984_v30, %v1949_v17 }
  0x82   :  { %v115_v44 = vmul.f32 %v2002_v39, %v1944_v16  ;;  %v127_v48 = vmul.f32 %v2011_v42, %v1944_v16  ;;  %v128_v49 = vmul.f32 %v1986_v31, %v1949_v17  ;;  %v428_v51 = vmul.f32 %v2002_v39, %v1954_v18 }
  0x83   :  { %v429_v52 = vmul.f32 %v1984_v30, %v1959_v19  ;;  %v431_v55 = vmul.f32 %v2011_v42, %v1954_v18  ;;  %v432_v56 = vmul.f32 %v1986_v31, %v1959_v19 }
  0x84   :  { %v1992_v32 = vpop.permute.xlu0 %130  ;;  %v133_v33 = vpop.permute.xlu1 %132  ;;  %v1487_v50 = vpack.i.bf16 %v116_v45, %v115_v44  ;;  %v1492_v54 = vpack.i.bf16 %v128_v49, %v127_v48 }
  0x85   :  { %v1994_v34 = vmul.f32 0.0, %v133_v33  ;;  %v434_v35 = vmul.f32 %v1992_v32, %v1954_v18  ;;  %v2033_v53 = vsel %vm134_vm2, %v1992_v32, %v133_v33  ;;  %v1497_v58 = vpack.i.bf16 %v429_v52, %v428_v51 }
  0x86   :  { %v435_v59 = vmul.f32 %v2033_v53, %v1959_v19  ;;  %v1502_v61 = vpack.i.bf16 %v432_v56, %v431_v55  ;;  %v139_v62 = vmul.f32 %v1992_v32, %v1944_v16  ;;  %v140_v63 = vmul.f32 %v2033_v53, %v1949_v17 }
  0x87   :  { %v1477_v36 = vpack.i.bf16 %v434_v35, %v1994_v34 }
  0x88   :  { %v1999_v37 = vpop.permute.xlu0 %142  ;;  %v145_v38 = vpop.permute.xlu1 %144  ;;  %v1512_v2 = vpack.i.bf16 %v1994_v34, %v435_v59  ;;  %v1507_v4 = vpack.i.bf16 %v140_v63, %v139_v62 }
  0x89   :  { %v2004_v40 = vmul.f32 0.0, %v145_v38  ;;  %1478 = vrot.lane.b32.xlu1 %v1477_v36, %s1883_s22  ;;  %v437_v41 = vmul.f32 %v1999_v37, %v1954_v18  ;;  %v2051_v0 = vsel %vm146_vm3, %v1999_v37, %v145_v38  ;;  %v151_v5 = vmul.f32 %v1999_v37, %v1944_v16 }
  0x8a   :  { %v152_v6 = vmul.f32 %v2051_v0, %v1949_v17  ;;  %v438_v11 = vmul.f32 %v2051_v0, %v1959_v19 }
  0x8b   :  { %v1482_v43 = vpack.i.bf16 %v437_v41, %v2004_v40 }
  0x8c   :  { %v2018_v46 = vpop.permute.xlu0 %154  ;;  %v157_v57 = vpop.permute.xlu1 %156  ;;  %v1517_v10 = vpack.i.bf16 %v152_v6, %v151_v5  ;;  %v1522_v21 = vpack.i.bf16 %v2004_v40, %v438_v11 }
  0x8d   :  { %1483 = vrot.lane.b32.xlu1 %v1482_v43, %s1884_s23  ;;  %v163_v47 = vmul.f32 %v2018_v46, %v1944_v16  ;;  %v440_v8 = vmul.f32 %v2018_v46, %v1954_v18  ;;  %v2065_v9 = vmul.f32 0.0, %v157_v57  ;;  %v2073_v15 = vsel %vm158_vm4, %v2018_v46, %v157_v57 }
  0x8e   :  { %v164_v25 = vmul.f32 %v2073_v15, %v1949_v17  ;;  %v441_v49 = vmul.f32 %v2073_v15, %v1959_v19 }
  0x8f   :  { %243 = vrot.lane.b32.xlu0 %v163_v47, %s1885_s24 }
  0x90   :  { %v2043_v60 = vpop.permute.xlu0 %73  ;;  %v2055_v3 = vpop.permute.xlu1 %75 }
  0x91   :  { %1488 = vrot.lane.b32.xlu1 %v1487_v50, %s1881_s20  ;;  %v2089_v41 = vmul.f32 0.0, %v2043_v60 }
  0x93   :  { %1493 = vrot.lane.b32.xlu0 %v1492_v54, %s1882_s21 }
  0x94   :  { %v1429_v7 = vpop.permute.xlu0 %1428  ;;  %v1434_v12 = vpop.permute.xlu1 %1433 }
  0x95   :  { %1498 = vrot.lane.b32.xlu1 %v1497_v58, %s1881_s20  ;;  %v1431_v13 = vunpack.i.h.bf16 %v1429_v7  ;;  %v1430_v20 = vunpack.i.l.bf16 %v1429_v7  ;;  %v1436_v22 = vunpack.i.h.bf16 %v1434_v12  ;;  %v1435_v23 = vunpack.i.l.bf16 %v1434_v12 }
  0x97   :  { %1503 = vrot.lane.b32.xlu0 %v1502_v61, %s1882_s21  ;;  %v176_v24 = vsel %vm121_vm1, %v1430_v20, %v1431_v13  ;;  %v453_v38 = vsel %vm121_vm1, %v1435_v23, %v1436_v22 }
  0x98   :  { %v1439_v14 = vpop.permute.xlu0 %1438  ;;  %v2082_v26 = vpop.permute.xlu1 %1443  ;;  %v1527_v35 = vpack.i.bf16 %v1431_v13, %v176_v24  ;;  %v1532_v50 = vpack.i.bf16 %v1436_v22, %v453_v38  ;;  %v426_v24 = vmul.f32 %v2055_v3, %v1959_v19 }
  0x99   :  { %1513 = vrot.lane.b32.xlu1 %v1512_v2, %s1883_s22  ;;  %v1440_v33 = vunpack.i.l.bf16 %v1439_v14  ;;  %v1441_v36 = vunpack.i.h.bf16 %v1439_v14  ;;  %v1446_v45 = vunpack.i.h.bf16 %v2082_v26  ;;  %v1445_v47 = vunpack.i.l.bf16 %v2082_v26 }
  0x9b   :  { %1508 = vrot.lane.b32.xlu0 %v1507_v4, %s1883_s22  ;;  %v175_v48 = vsel %vm121_vm1, %v1440_v33, %v1430_v20  ;;  %v452_v52 = vsel %vm121_vm1, %v1441_v36, %v1435_v23  ;;  %v205_v59 = vsel %vm77_vm5, %v1445_v47, %v1446_v45 }
  0x9c   :  { %v1449_v27 = vpop.permute.xlu0 %1448  ;;  %v1459_v43 = vpop.permute.xlu1 %1458  ;;  %v1537_v56 = vpack.i.bf16 %v175_v48, %v2089_v41  ;;  %v1542_v62 = vpack.i.bf16 %v452_v52, %v2089_v41  ;;  %v1547_v7 = vpack.i.bf16 %v1446_v45, %v205_v59 }
  0x9d   :  { %515 = vrot.lane.b32.xlu1 %v440_v8, %s1885_s24  ;;  %v1460_v51 = vunpack.i.l.bf16 %v1459_v43  ;;  %v1451_v57 = vunpack.i.h.bf16 %v1449_v27  ;;  %v1450_v58 = vunpack.i.l.bf16 %v1449_v27  ;;  %v1461_v61 = vunpack.i.h.bf16 %v1459_v43 }
  0x9f   :  { %1518 = vrot.lane.b32.xlu0 %v1517_v10, %s1884_s23  ;;  %v480_v8 = vsel %vm77_vm5, %v1450_v58, %v1451_v57  ;;  %v2118_v10 = vsel %vm77_vm5, %v2043_v60, %v2055_v3 }
  0xa0   :  { %v2091_v44 = vpop.permute.xlu0 %1453  ;;  %v1464_v63 = vpop.permute.xlu1 %1463  ;;  %v1552_v14 = vpack.i.bf16 %v1451_v57, %v480_v8  ;;  %v83_v20 = vmul.f32 %v2118_v10, %v1944_v16  ;;  %v425_v23 = vmul.f32 %v2118_v10, %v1954_v18 }
  0xa1   :  { %519 = vrot.lane.b32.xlu1 %v2065_v9, %s1885_s24  ;;  %v1456_v54 = vunpack.i.h.bf16 %v2091_v44  ;;  %v1455_v55 = vunpack.i.l.bf16 %v2091_v44  ;;  %v1466_v2 = vunpack.i.h.bf16 %v1464_v63  ;;  %v1465_v4 = vunpack.i.l.bf16 %v1464_v63 }
  0xa2   :  { %v1572_v16 = vpack.i.bf16 %v426_v24, %v425_v23 }
  0xa3   :  { %1523 = vrot.lane.b32.xlu0 %v1522_v21, %s1884_s23  ;;  %v238_v5 = vsel %vm237_vm6, %v1455_v55, %v1456_v54  ;;  %v239_v6 = vsel %vm237_vm6, %v1456_v54, %v1460_v51  ;;  %v510_v12 = vsel %vm237_vm6, %v1461_v61, %v1465_v4  ;;  %v511_v13 = vsel %vm237_vm6, %v1465_v4, %v1466_v2 }
  0xa4   :  { %v1557_v11 = vpack.i.bf16 %v239_v6, %v238_v5  ;;  %v84_v21 = vmul.f32 %v2055_v3, %v1949_v17  ;;  %v1562_v60 = vpack.i.bf16 %v511_v13, %v510_v12 }
  0xa5   :  { %245 = vrot.lane.b32.xlu1 %v164_v25, %s1885_s24 }
  0xa6   :  { %v1567_v22 = vpack.i.bf16 %v84_v21, %v83_v20 }
  0xa7   :  { %247 = vrot.lane.b32.xlu0 %v2065_v9, %s1885_s24 }
  0xa9   :  { %1528 = vrot.lane.b32.xlu1 %v1527_v35, %s1878_s10 }
  0xab   :  { %517 = vrot.lane.b32.xlu0 %v441_v49, %s1885_s24 }
  0xad   :  { %1533 = vrot.lane.b32.xlu1 %v1532_v50, %s1878_s10 }
  0xaf   :  { %1538 = vrot.lane.b32.xlu0 %v1537_v56, %s1878_s10 }
  0xb1   :  { %1543 = vrot.lane.b32.xlu1 %v1542_v62, %s1878_s10 }
  0xb3   :  { %1548 = vrot.lane.b32.xlu0 %v1547_v7, %s1878_s10 }
  0xb5   :  { %1558 = vrot.lane.b32.xlu1 %v1557_v11, %s1878_s10 }
  0xb7   :  { %1553 = vrot.lane.b32.xlu0 %v1552_v14, %s1878_s10 }
  0xb9   :  { %1563 = vrot.lane.b32.xlu1 %v1562_v60, %s1878_s10 }
  0xbb   :  { %1568 = vrot.lane.b32.xlu0 %v1567_v22, %s1878_s10 }
  0xbf   :  { %1573 = vrot.lane.b32.xlu0 %v1572_v16, %s1878_s10 }
  0xf3   :  { %v2137_v17 = vpop.permute.xlu1 %1468  ;;  %v2139_v27 = vpop.permute.xlu0 %1473 }
  0xf4   :  { %v1476_v59 = vunpack.i.h.bf16 %v2139_v27  ;;  %v1471_v4 = vunpack.i.h.bf16 %v2137_v17 }
  0xfb   :  { %v1479_v25 = vpop.permute.xlu1 %1478 }
  0xfc   :  { %v1481_v33 = vunpack.i.h.bf16 %v1479_v25  ;;  %v1480_v11 = vunpack.i.l.bf16 %v1479_v25 }
  0xfe   :  { %v1582_v35 = vpack.i.bf16 %v1481_v33, %v1450_v58 }
  0xff   :  { %v2141_v36 = vpop.permute.xlu1 %1483 }
 0x100   :  { %v1486_v18 = vunpack.i.h.bf16 %v2141_v36  ;;  %1583 = vrot.lane.b32.xlu1 %v1582_v35, %s1878_s10 }
 0x101   :  { %v2145_v19 = vpop.permute.xlu0 %243 }
 0x102   :  { %v1592_v38 = vpack.i.bf16 %v1461_v61, %v1486_v18 }
 0x103   :  { %v2149_v43 = vpop.permute.xlu1 %1488 }
 0x104   :  { %1593 = vrot.lane.b32.xlu1 %v1592_v38, %s1878_s10  ;;  %v1491_v14 = vunpack.i.h.bf16 %v2149_v43  ;;  %v1490_v20 = vunpack.i.l.bf16 %v2149_v43 }
 0x105   :  { %v2152_v45 = vpop.permute.xlu0 %1493 }
 0x106   :  { %v1496_v48 = vunpack.i.h.bf16 %v2152_v45  ;;  %v1495_v49 = vunpack.i.l.bf16 %v2152_v45  ;;  %v188_v45 = vsel %vm186_vm8, %v1490_v20, %v1491_v14 }
 0x107   :  { %v1499_v50 = vpop.permute.xlu1 %1498 }
 0x108   :  { %v200_v51 = vsel %vm198_vm7, %v1495_v49, %v1496_v48  ;;  %v1500_v61 = vunpack.i.l.bf16 %v1499_v50 }
 0x109   :  { %v1504_v52 = vpop.permute.xlu0 %1503  ;;  %v1602_v54 = vpack.i.bf16 %v1496_v48, %v200_v51 }
 0x10a   :  { %v1506_v56 = vunpack.i.h.bf16 %v1504_v52  ;;  %v1505_v57 = vunpack.i.l.bf16 %v1504_v52  ;;  %v463_v13 = vsel %vm186_vm8, %v1471_v4, %v1500_v61  ;;  %v1597_v52 = vpack.i.bf16 %v1491_v14, %v188_v45 }
 0x10b   :  { %1603 = vrot.lane.b32.xlu1 %v1602_v54, %s1878_s10  ;;  %v1514_v58 = vpop.permute.xlu1 %1513 }
 0x10c   :  { %v475_v62 = vsel %vm198_vm7, %v1505_v57, %v1506_v56  ;;  %v474_v7 = vsel %vm198_vm7, %v1476_v59, %v1505_v57  ;;  %v1516_v21 = vunpack.i.h.bf16 %v1514_v58  ;;  %v1515_v23 = vunpack.i.l.bf16 %v1514_v58 }
 0x10d   :  { %v1509_v63 = vpop.permute.xlu0 %1508  ;;  %v1612_v2 = vpack.i.bf16 %v1506_v56, %v475_v62  ;;  %v1622_v22 = vpack.i.bf16 %v474_v7, %v463_v13  ;;  %v1470_v58 = vunpack.i.l.bf16 %v2137_v17 }
 0x10e   :  { %v1511_v5 = vunpack.i.h.bf16 %v1509_v63  ;;  %v1510_v6 = vunpack.i.l.bf16 %v1509_v63  ;;  %v490_v48 = vsel %vm215_vm9, %v1481_v33, %v1515_v23  ;;  %v491_v51 = vsel %vm215_vm9, %v1515_v23, %v1516_v21 }
 0x10f   :  { %1613 = vrot.lane.b32.xlu1 %v1612_v2, %s1878_s10  ;;  %v2163_v8 = vpop.permute.xlu1 %515  ;;  %v1632_v56 = vpack.i.bf16 %v491_v51, %v490_v48 }
 0x110   :  { %v1577_v12 = vpack.i.bf16 %v1510_v6, %v1445_v47  ;;  %v216_v16 = vsel %vm215_vm9, %v1510_v6, %v1511_v5  ;;  %v217_v25 = vsel %vm215_vm9, %v1511_v5, %v1480_v11  ;;  %v1501_v47 = vunpack.i.h.bf16 %v1499_v50 }
 0x111   :  { %v1519_v60 = vpop.permute.xlu0 %1518  ;;  %v1627_v43 = vpack.i.bf16 %v217_v25, %v216_v16 }
 0x112   :  { %v1520_v24 = vunpack.i.l.bf16 %v1519_v60  ;;  %1578 = vrot.lane.b32.xlu0 %v1577_v12, %s1878_s10  ;;  %v464_v44 = vsel %vm186_vm8, %v1500_v61, %v1501_v47  ;;  %v1521_v33 = vunpack.i.h.bf16 %v1519_v60  ;;  %v1485_v61 = vunpack.i.l.bf16 %v2141_v36 }
 0x113   :  { %1623 = vrot.lane.b32.xlu1 %v1622_v22, %s1878_s10  ;;  %v520_v35 = vpop.permute.xlu1 %519  ;;  %v1607_v57 = vpack.i.bf16 %v1501_v47, %v464_v44 }
 0x114   :  { %v1587_v26 = vpack.i.bf16 %v1455_v55, %v1520_v24  ;;  %v1475_v55 = vunpack.i.l.bf16 %v2139_v27  ;;  %v187_v27 = vsel %vm186_vm8, %v1470_v58, %v1490_v20  ;;  %v228_v6 = vsel %vm227_vm11, %v1520_v24, %v1521_v33 }
 0x115   :  { %v1524_v38 = vpop.permute.xlu0 %1523  ;;  %v229_v7 = vsel %vm227_vm11, %v1521_v33, %v1485_v61 }
 0x116   :  { %1588 = vrot.lane.b32.xlu0 %v1587_v26, %s1878_s10  ;;  %v199_v62 = vsel %vm198_vm7, %v1475_v55, %v1495_v49  ;;  %v1526_v5 = vunpack.i.h.bf16 %v1524_v38  ;;  %v1525_v17 = vunpack.i.l.bf16 %v1524_v38  ;;  %v1637_v12 = vpack.i.bf16 %v229_v7, %v228_v6 }
 0x117   :  { %1628 = vrot.lane.b32.xlu1 %v1627_v43, %s1878_s10  ;;  %v246_v50 = vpop.permute.xlu1 %245  ;;  %v1617_v4 = vpack.i.bf16 %v199_v62, %v187_v27 }
 0x118   :  { %v501_v13 = vsel %vm227_vm11, %v1486_v18, %v1525_v17  ;;  %v502_v14 = vsel %vm227_vm11, %v1525_v17, %v1526_v5  ;;  %v250_v25 = vsel %vm249_vm10, %v2145_v19, %v246_v50 }
 0x119   :  { %v248_v54 = vpop.permute.xlu0 %247  ;;  %v1642_v60 = vpack.i.bf16 %v502_v14, %v501_v13 }
 0x11a   :  { %1598 = vrot.lane.b32.xlu0 %v1597_v52, %s1878_s10  ;;  %v251_v63 = vsel %vm249_vm10, %v246_v50, %v248_v54 }
 0x11b   :  { %1633 = vrot.lane.b32.xlu1 %v1632_v56, %s1878_s10  ;;  %v1529_v2 = vpop.permute.xlu1 %1528 }
 0x11c   :  { %v1531_v23 = vunpack.i.h.bf16 %v1529_v2  ;;  %v1530_v24 = vunpack.i.l.bf16 %v1529_v2 }
 0x11d   :  { %v518_v59 = vpop.permute.xlu0 %517 }
 0x11e   :  { %1608 = vrot.lane.b32.xlu0 %v1607_v57, %s1878_s10  ;;  %v522_v11 = vsel %vm249_vm10, %v518_v59, %v520_v35  ;;  %v312_v38 = vsel %vm158_vm4, %v1530_v24, %v1531_v23  ;;  %v521_v44 = vsel %vm249_vm10, %v2163_v8, %v518_v59 }
 0x11f   :  { %307 = vrot.lane.b32.xlu1 %v251_v63, %s1878_s10  ;;  %v1534_v21 = vpop.permute.xlu1 %1533 }
 0x120   :  { %v1536_v47 = vunpack.i.h.bf16 %v1534_v21  ;;  %v1535_v35 = vunpack.i.l.bf16 %v1534_v21 }
 0x121   :  { %v1539_v49 = vpop.permute.xlu0 %1538 }
 0x122   :  { %1618 = vrot.lane.b32.xlu0 %v1617_v4, %s1878_s10  ;;  %v1541_v36 = vunpack.i.h.bf16 %v1539_v49  ;;  %v1540_v18 = vunpack.i.l.bf16 %v1539_v49  ;;  %v583_v62 = vsel %vm158_vm4, %v1535_v35, %v1536_v47 }
 0x123   :  { %578 = vrot.lane.b32.xlu1 %v522_v11, %s1878_s10  ;;  %v1544_v16 = vpop.permute.xlu1 %1543 }
 0x124   :  { %v1546_v48 = vunpack.i.h.bf16 %v1544_v16  ;;  %v311_v51 = vsel %vm158_vm4, %v1541_v36, %v1530_v24  ;;  %v1545_v52 = vunpack.i.l.bf16 %v1544_v16 }
 0x125   :  { %v2201_v20 = vpop.permute.xlu0 %1548 }
 0x126   :  { %1638 = vrot.lane.b32.xlu0 %v1637_v12, %s1878_s10  ;;  %v582_v63 = vsel %vm158_vm4, %v1546_v48, %v1535_v35 }
 0x127   :  { %574 = vrot.lane.b32.xlu1 %v2163_v8, %s1878_s10  ;;  %v2225_v8 = vpop.permute.xlu1 %1558 }
 0x129   :  { %v2206_v22 = vpop.permute.xlu0 %1553 }
 0x12a   :  { %1643 = vrot.lane.b32.xlu0 %v1642_v60, %s1878_s10 }
 0x12b   :  { %v2227_v59 = vpop.permute.xlu1 %1563 }
 0x12d   :  { %v1569_v26 = vpop.permute.xlu0 %1568 }
 0x12e   :  { %305 = vrot.lane.b32.xlu0 %v250_v25, %s1878_s10  ;;  %v1571_v43 = vunpack.i.h.bf16 %v1569_v26  ;;  %v1570_v45 = vunpack.i.l.bf16 %v1569_v26 }
 0x130   :  { %v310_v54 = vsel %vm158_vm4, %v1570_v45, %v1571_v43  ;;  %v309_v56 = vsel %vm158_vm4, %v1540_v18, %v1570_v45  ;;  %v1550_v43 = vunpack.i.l.bf16 %v2201_v20  ;;  %v1556_v45 = vunpack.i.h.bf16 %v2206_v22 }
 0x131   :  { %v1574_v55 = vpop.permute.xlu0 %1573  ;;  %v1349_v50 = vpack.c.bf16 %v312_v38, %v310_v54  ;;  %v1351_v57 = vpack.c.bf16 %v311_v51, %v309_v56  ;;  %v1551_v38 = vunpack.i.h.bf16 %v2201_v20 }
 0x132   :  { %576 = vrot.lane.b32.xlu0 %v521_v44, %s1878_s10  ;;  %v1576_v58 = vunpack.i.h.bf16 %v1574_v55  ;;  %v1575_v33 = vunpack.i.l.bf16 %v1574_v55  ;;  %v1561_v55 = vunpack.i.h.bf16 %v2225_v8 }
 0x133   :  { %1350 = vmatprep.subr.bf16.mxu0 %v1349_v50 }
 0x134   :  { %v581_v61 = vsel %vm158_vm4, %v1575_v33, %v1576_v58  ;;  %1352 = vmatpush1.bf16.msra.mxu0 %v1351_v57  ;;  %v580_v27 = vsel %vm158_vm4, %v1545_v52, %v1575_v33  ;;  %v1555_v52 = vunpack.i.l.bf16 %v2206_v22 }
 0x135   :  { %v1365_v2 = vpack.c.bf16 %v583_v62, %v581_v61  ;;  %v1367_v4 = vpack.c.bf16 %v582_v63, %v580_v27 }
 0x136   :  { %303 = vrot.lane.b32.xlu0 %v2145_v19, %s1878_s10 }
 0x137   :  { %1366 = vmatprep.subr.bf16.mxu1 %v1365_v2 }
 0x138   :  { %1368 = vmatpush1.bf16.msra.mxu1 %v1367_v4 }
 0x172   :  { %v2229_v5 = vpop.permute.xlu1 %1583 }
 0x173   :  { %v1586_v22 = vunpack.i.h.bf16 %v2229_v5  ;;  %v1585_v61 = vunpack.i.l.bf16 %v2229_v5 }
 0x176   :  { %v2231_v17 = vpop.permute.xlu1 %1593 }
 0x17d   :  { %v1604_v6 = vpop.permute.xlu1 %1603 }
 0x17e   :  { %v1606_v14 = vunpack.i.h.bf16 %v1604_v6  ;;  %v1605_v19 = vunpack.i.l.bf16 %v1604_v6  ;;  %v1560_v6 = vunpack.i.l.bf16 %v2225_v8 }
 0x180   :  { %v316_v18 = vsel %vm158_vm4, %v1605_v19, %v1606_v14 }
 0x181   :  { %v1614_v7 = vpop.permute.xlu1 %1613 }
 0x182   :  { %v1616_v36 = vunpack.i.h.bf16 %v1614_v7  ;;  %v1615_v16 = vunpack.i.l.bf16 %v1614_v7 }
 0x184   :  { %v2233_v49 = vpop.permute.xlu0 %1578  ;;  %v587_v58 = vsel %vm158_vm4, %v1615_v16, %v1616_v36 }
 0x185   :  { %v1624_v11 = vpop.permute.xlu1 %1623  ;;  %v1581_v14 = vunpack.i.h.bf16 %v2233_v49  ;;  %v1580_v36 = vunpack.i.l.bf16 %v2233_v49  ;;  %v1566_v49 = vunpack.i.h.bf16 %v2227_v59 }
 0x186   :  { %v1626_v25 = vunpack.i.h.bf16 %v1624_v11  ;;  %v1625_v54 = vunpack.i.l.bf16 %v1624_v11 }
 0x188   :  { %v2235_v12 = vpop.permute.xlu0 %1588  ;;  %v586_v62 = vsel %vm158_vm4, %v1626_v25, %v1615_v16 }
 0x189   :  { %v1629_v13 = vpop.permute.xlu1 %1628 }
 0x18a   :  { %v1631_v50 = vunpack.i.h.bf16 %v1629_v13  ;;  %v1630_v57 = vunpack.i.l.bf16 %v1629_v13  ;;  %v589_v13 = vsel %vm158_vm4, %v1555_v52, %v1556_v45 }
 0x18c   :  { %v1599_v21 = vpop.permute.xlu0 %1598  ;;  %v319_v45 = vsel %vm158_vm4, %v1581_v14, %v1630_v57 }
 0x18d   :  { %v1601_v60 = vunpack.i.h.bf16 %v1599_v21  ;;  %v1600_v23 = vunpack.i.l.bf16 %v1599_v21  ;;  %v1634_v24 = vpop.permute.xlu1 %1633 }
 0x18e   :  { %v1636_v26 = vunpack.i.h.bf16 %v1634_v24  ;;  %v1635_v47 = vunpack.i.l.bf16 %v1634_v24 }
 0x18f   :  { %v314_v35 = vsel %vm158_vm4, %v1600_v23, %v1601_v60  ;;  %v320_v60 = vsel %vm158_vm4, %v1630_v57, %v1631_v50 }
 0x190   :  { %v1609_v48 = vpop.permute.xlu0 %1608  ;;  %v1353_v51 = vpack.c.bf16 %v316_v18, %v314_v35  ;;  %v591_v63 = vsel %vm158_vm4, %v1635_v47, %v1636_v26  ;;  %v590_v24 = vsel %vm158_vm4, %v1586_v22, %v1635_v47  ;;  %v318_v26 = vsel %vm158_vm4, %v1550_v43, %v1551_v38 }
 0x191   :  { %v1611_v56 = vunpack.i.h.bf16 %v1609_v48  ;;  %v1610_v44 = vunpack.i.l.bf16 %v1609_v48  ;;  %v1373_v21 = vpack.c.bf16 %v591_v63, %v589_v13  ;;  %v308_v8 = vpop.permute.xlu1 %307  ;;  %v588_v35 = vsel %vm158_vm4, %v1585_v61, %v1555_v52 }
 0x192   :  { %1354 = vmatprep.subr.bf16.mxu0 %v1353_v51  ;;  %v1357_v47 = vpack.c.bf16 %v320_v60, %v318_v26  ;;  %v1590_v38 = vunpack.i.l.bf16 %v2235_v12  ;;  %v317_v52 = vsel %vm158_vm4, %v1580_v36, %v1550_v43  ;;  %v46_v60 = vld [vmem:[%s2558_s2] sm:$0xff] }
 0x193   :  { %v585_v33 = vsel %vm158_vm4, %v1610_v44, %v1611_v56  ;;  %v584_v20 = vsel %vm158_vm4, %v1625_v54, %v1610_v44  ;;  %v1375_v54 = vpack.c.bf16 %v590_v24, %v588_v35  ;;  %v324_v56 = vsel %vm158_vm4, %v1560_v6, %v1561_v55 }
 0x194   :  { %v1619_v27 = vpop.permute.xlu0 %1618  ;;  %v1369_v2 = vpack.c.bf16 %v587_v58, %v585_v33  ;;  %v1371_v4 = vpack.c.bf16 %v586_v62, %v584_v20  ;;  %v1591_v44 = vunpack.i.h.bf16 %v2235_v12  ;;  %v1359_v58 = vpack.c.bf16 %v319_v45, %v317_v52 }
 0x195   :  { %v1621_v7 = vunpack.i.h.bf16 %v1619_v27  ;;  %v1620_v11 = vunpack.i.l.bf16 %v1619_v27  ;;  %v579_v55 = vpop.permute.xlu1 %578  ;;  %v1886_v35 = vmov 0  }
 0x196   :  { %1370 = vmatprep.subr.bf16.mxu1 %v1369_v2  ;;  %v323_v12 = vsel %vm158_vm4, %v1591_v44, %v1560_v6  ;;  %1648 = vset.pattern.permute.xlu0 %v1886_v35 }
 0x197   :  { %1372 = vmatpush1.bf16.msra.mxu1 %v1371_v4  ;;  %v313_v5 = vsel %vm158_vm4, %v1620_v11, %v1600_v23  ;;  %v315_v16 = vsel %vm158_vm4, %v1621_v7, %v1605_v19  ;;  %v1565_v23 = vunpack.i.l.bf16 %v2227_v59  ;;  %v1596_v19 = vunpack.i.h.bf16 %v2231_v17  ;;  %1647 = vset.pattern.permute.xlu1 %v1886_v35 }
 0x198   :  { %v1639_v18 = vpop.permute.xlu0 %1638  ;;  %1374 = vmatprep.subr.bf16.mxu1 %v1373_v21  ;;  %v1355_v25 = vpack.c.bf16 %v315_v16, %v313_v5  ;;  %v1595_v59 = vunpack.i.l.bf16 %v2231_v17 }
 0x199   :  { %v1641_v48 = vunpack.i.h.bf16 %v1639_v18  ;;  %v1640_v51 = vunpack.i.l.bf16 %v1639_v18  ;;  %v595_v22 = vsel %vm158_vm4, %v1565_v23, %v1566_v49  ;;  %v594_v27 = vsel %vm158_vm4, %v1596_v19, %v1565_v23  ;;  %v575_v13 = vpop.permute.xlu1 %574 }
 0x19a   :  { %1356 = vmatpush1.bf16.msra.mxu0 %v1355_v25 }
 0x19b   :  { %1358 = vmatprep.subr.bf16.mxu0 %v1357_v47  ;;  %1376 = vmatpush1.bf16.msra.mxu1 %v1375_v54  ;;  %v322_v50 = vsel %vm158_vm4, %v1640_v51, %v1641_v48  ;;  %v321_v63 = vsel %vm158_vm4, %v1590_v38, %v1640_v51 }
 0x19c   :  { %v1644_v57 = vpop.permute.xlu0 %1643  ;;  %v1361_v33 = vpack.c.bf16 %v324_v56, %v322_v50  ;;  %v1363_v4 = vpack.c.bf16 %v323_v12, %v321_v63 }
 0x19d   :  { %v1646_v20 = vunpack.i.h.bf16 %v1644_v57  ;;  %v1645_v62 = vunpack.i.l.bf16 %v1644_v57 }
 0x19e   :  { %1360 = vmatpush1.bf16.msra.mxu0 %v1359_v58  ;;  %v48_v58 = vld [vmem:[%s2559_s4] sm:$0xff] }
 0x19f   :  { %1362 = vmatprep.subr.bf16.mxu0 %v1361_v33  ;;  %v593_v43 = vsel %vm158_vm4, %v1645_v62, %v1646_v20  ;;  %v592_v61 = vsel %vm158_vm4, %v1595_v59, %v1645_v62 }
 0x1a0   :  { %v306_v2 = vpop.permute.xlu0 %305  ;;  %v1377_v17 = vpack.c.bf16 %v595_v22, %v593_v43  ;;  %v1379_v7 = vpack.c.bf16 %v594_v27, %v592_v61 }
 0x1a1   :  { %v326_v11 = vsel %vm158_vm4, %v306_v2, %v308_v8 }
 0x1a2   :  { %1364 = vmatpush1.bf16.msra.mxu0 %v1363_v4  ;;  %1378 = vmatprep.subr.bf16.mxu1 %v1377_v17 }
 0x1a3   :  { %365 = vmatprep.subr.mxu0 %v326_v11  ;;  %1380 = vmatpush1.bf16.msra.mxu1 %v1379_v7 }
 0x1a4   :  { %v577_v14 = vpop.permute.xlu0 %576 }
 0x1a5   :  { %v597_v6 = vsel %vm158_vm4, %v577_v14, %v579_v55  ;;  %v596_v21 = vsel %vm158_vm4, %v575_v13, %v577_v14  ;;  %v47_v55 = vld [vmem:[%s2560_s3] sm:$0xff] }
 0x1a6   :  { %632 = vmatprep.subr.mxu1 %v597_v6 }
 0x1a7   :  { %633 = vmatpush1.msra.mxu1 %v596_v21 }
 0x1a8   :  { %v304_v24 = vpop.permute.xlu0 %303  ;;  %1346 = vmatmul.mubr.msk.f32.vlgmr.msra.gmra.mrb[0].mxu1 %vm345_vm12, %v46_v60 }
 0x1a9   :  { %v325_v36 = vsel %vm158_vm4, %v304_v24, %v306_v2  ;;  %1281 = vmatprep.mubr.f32.mxu1 %v1873_v1 }
 0x1aa   :  { %366 = vmatpush1.msra.mxu0 %v325_v36 }
 0x1ab   :  { %1345 = vmatmul.mubr.msk.f32.vlgmr.msra.gmra.mrb[0].mxu0 %vm345_vm12, %v46_v60 }
 0x1ac   :  { %1014 = vmatprep.mubr.f32.mxu0 %v1873_v1 }
 0x27b   :  { %v682_v5 = vpop.f32.mrb[0].mxu1 }
 0x27c   :  { %v684_v16 = vpop.f32.mrb[1].mxu1 }
 0x27d   :  { %v690_v8 = vadd.f32 %v684_v16, %v682_v5 }
 0x27e   :  { %v415_v18 = vpop.f32.mrb[0].mxu0 }
 0x27f   :  { %v417_v25 = vpop.f32.mrb[1].mxu0  ;;  %691 = vadd.xlane.f32.xlu1 %v690_v8 }
 0x280   :  { %v687_v26 = vadd.f32 %v417_v25, %v415_v18 }
 0x282   :  { %688 = vadd.xlane.f32.xlu0 %v687_v26 }
 0x30c   :  { %v692_v45 = vpop.xlane.xlu1 %691 }
 0x30f   :  { %v689_v48 = vpop.xlane.xlu0 %688 }
 0x310   :  { %v693_v51 = vadd.f32 %v692_v45, %v689_v48 }
 0x312   :  { %v695_v47 = vmul.f32 0.001953125, %v693_v51 }
 0x314   :  { %v696_v54 = vsub.f32 %v415_v18, %v695_v47  ;;  %v697_v49 = vsub.f32 %v417_v25, %v695_v47  ;;  %v698_v23 = vsub.f32 %v682_v5, %v695_v47  ;;  %v699_v19 = vsub.f32 %v684_v16, %v695_v47 }
 0x316   :  { %v700_v56 = vmul.f32 %v696_v54, %v696_v54  ;;  %v701_v44 = vmul.f32 %v697_v49, %v697_v49  ;;  %v702_v52 = vmul.f32 %v698_v23, %v698_v23  ;;  %v703_v50 = vmul.f32 %v699_v19, %v699_v19 }
 0x318   :  { %v704_v38 = vadd.f32 %v701_v44, %v700_v56  ;;  %v707_v57 = vadd.f32 %v703_v50, %v702_v52 }
 0x31a   :  { %705 = vadd.xlane.f32.xlu0 %v704_v38 }
 0x31e   :  { %708 = vadd.xlane.f32.xlu0 %v707_v57 }
 0x334   :  { %726 = vperm.xlu0 %1648, %v48_v58  }
 0x338   :  { %1660 = vrot.lane.b32.xlu0 %v1982_v29, %s1882_s21 }
 0x33c   :  { %850 = vrot.lane.b32.xlu0 %v2065_v9, %s1885_s24 }
 0x3a7   :  { %v706_v33 = vpop.xlane.xlu0 %705 }
 0x3ab   :  { %v709_v59 = vpop.xlane.xlu0 %708 }
 0x3ac   :  { %v710_v20 = vadd.f32 %v709_v59, %v706_v33 }
 0x3ae   :  { %v711_v62 = vmul.f32 0.001953125, %v710_v20 }
 0x3b0   :  { %v712_v63 = vadd.f32 1e-05, %v711_v62 }
 0x3b2   :  { %1869 = vrsqrt.f32 %v712_v63 }
 0x3b3   :  { %v727_v4 = vpop.permute.xlu0 %726 }
 0x3bc   :  { %v1870_v22 = vpop.eup %1869 }
 0x3bd   :  { %v714_v12 = vmul.f32 %v1870_v22, %v47_v55 }
 0x3bf   :  { %717 = vperm.xlu1 %1647, %v714_v12  }
 0x3c3   :  { %1650 = vrot.lane.b32.xlu1 %v1873_v1, %s1875_s30 }
 0x3c7   :  { %1655 = vrot.lane.b32.xlu1 %v1980_v28, %s1881_s20 }
 0x3cb   :  { %1120 = vrot.lane.b32.xlu1 %v2065_v9, %s1885_s24 }
 0x43e   :  { %v718_v29 = vpop.permute.xlu1 %717 }
 0x43f   :  { %v720_v43 = vmul.f32 %v718_v29, %v696_v54  ;;  %v721_v61 = vmul.f32 %v718_v29, %v697_v49  ;;  %v722_v27 = vmul.f32 %v718_v29, %v698_v23  ;;  %v723_v2 = vmul.f32 %v718_v29, %v699_v19 }
 0x441   :  { %v729_v17 = vadd.f32 %v727_v4, %v720_v43  ;;  %v730_v7 = vadd.f32 %v727_v4, %v721_v61  ;;  %v731_v11 = vadd.f32 %v727_v4, %v722_v27  ;;  %v732_v13 = vadd.f32 %v727_v4, %v723_v2 }
 0x442   :  { %v1651_v63 = vpop.permute.xlu1 %1650 }
 0x443   :  { %v733_v14 = vmax.f32 %v729_v17, 0.0  ;;  %v734_v6 = vmax.f32 %v730_v7, 0.0  ;;  %v2304_v21 = vmax.f32 %v731_v11, 0.0  ;;  %v736_v60 = vmax.f32 %v732_v13, 0.0 }
 0x444   :  { %v1653_v13 = vunpack.i.h.bf16 %v1651_v63 }
 0x445   :  { %v1679_v28 = vpack.i.bf16 %v736_v60, %v2304_v21  ;;  %v1664_v24 = vpack.i.bf16 %v734_v6, %v733_v14  ;;  %v765_v9 = vmul.f32 %v733_v14, %v1992_v32  ;;  %v766_v36 = vmul.f32 %v734_v6, %v2033_v53 }
 0x446   :  { %v768_v16 = vmul.f32 %v733_v14, %v1999_v37  ;;  %v769_v8 = vmul.f32 %v734_v6, %v2051_v0  ;;  %v1689_v18 = vpack.i.bf16 %v2304_v21, %v1873_v1  ;;  %v1039_v26 = vmul.f32 %v736_v60, %v2051_v0  ;;  %v2369_v55 = vpop.permute.xlu1 %1655 }
 0x447   :  { %1680 = vrot.lane.b32.xlu0 %v1679_v28, %s1879_s19  ;;  %1665 = vrot.lane.b32.xlu1 %v1664_v24, %s1875_s30  ;;  %v1719_v5 = vpack.i.bf16 %v766_v36, %v765_v9  ;;  %v1694_v35 = vpack.i.bf16 %v1873_v1, %v736_v60  ;;  %v759_v48 = vmul.f32 %v733_v14, %v2002_v39 }
 0x448   :  { %v1734_v25 = vpack.i.bf16 %v769_v8, %v768_v16  ;;  %v1744_v45 = vpack.i.bf16 %v2004_v40, %v1039_v26  ;;  %v760_v51 = vmul.f32 %v734_v6, %v1984_v30  ;;  %v771_v47 = vmul.f32 %v733_v14, %v2018_v46 }
 0x449   :  { %v762_v0 = vmul.f32 %v733_v14, %v2011_v42  ;;  %v763_v49 = vmul.f32 %v734_v6, %v1986_v31  ;;  %v1042_v1 = vmul.f32 %v736_v60, %v2073_v15  ;;  %v1029_v23 = vmul.f32 %v2304_v21, %v2002_v39 }
 0x44a   :  { %v1699_v54 = vpack.i.bf16 %v760_v51, %v759_v48  ;;  %v1030_v56 = vmul.f32 %v736_v60, %v1984_v30  ;;  %v756_v44 = vmul.f32 %v733_v14, %v2118_v10  ;;  %v757_v38 = vmul.f32 %v734_v6, %v2055_v3  ;;  %v2373_v22 = vpop.permute.xlu1 %1120 }
 0x44b   :  { %1685 = vrot.lane.b32.xlu0 %v1664_v24, %s1880_s0  ;;  %1670 = vrot.lane.b32.xlu1 %v1679_v28, %s1875_s30  ;;  %v1704_v19 = vpack.i.bf16 %v763_v49, %v762_v0  ;;  %v1032_v52 = vmul.f32 %v2304_v21, %v2011_v42  ;;  %v1033_v50 = vmul.f32 %v736_v60, %v1986_v31 }
 0x44c   :  { %v1709_v57 = vpack.i.bf16 %v1030_v56, %v1029_v23  ;;  %v1749_v58 = vpack.i.bf16 %v757_v38, %v756_v44  ;;  %v1026_v39 = vmul.f32 %v2304_v21, %v2118_v10  ;;  %v1027_v30 = vmul.f32 %v736_v60, %v2055_v3 }
 0x44d   :  { %v1714_v33 = vpack.i.bf16 %v1033_v50, %v1032_v52  ;;  %v1035_v20 = vmul.f32 %v2304_v21, %v1992_v32  ;;  %v1036_v42 = vmul.f32 %v736_v60, %v2033_v53  ;;  %v1038_v10 = vmul.f32 %v2304_v21, %v1999_v37 }
 0x44e   :  { %v1754_v59 = vpack.i.bf16 %v1027_v30, %v1026_v39  ;;  %v772_v32 = vmul.f32 %v734_v6, %v2073_v15  ;;  %v1041_v53 = vmul.f32 %v2304_v21, %v2018_v46  ;;  %v1652_v15 = vunpack.i.l.bf16 %v1651_v63 }
 0x44f   :  { %1675 = vrot.lane.b32.xlu1 %v1664_v24, %s1879_s19  ;;  %1720 = vrot.lane.b32.xlu0 %v1719_v5, %s1883_s22  ;;  %v1724_v31 = vpack.i.bf16 %v1035_v20, %v1994_v34  ;;  %v1729_v3 = vpack.i.bf16 %v1994_v34, %v1036_v42  ;;  %v1739_v62 = vpack.i.bf16 %v1038_v10, %v2004_v40  ;;  %v2367_v34 = vpop.permute.xlu0 %1660 }
 0x453   :  { %1690 = vrot.lane.b32.xlu1 %v1689_v18, %s1880_s0  ;;  %1735 = vrot.lane.b32.xlu0 %v1734_v25, %s1884_s23  ;;  %v2371_v37 = vpop.permute.xlu0 %850 }
 0x457   :  { %1695 = vrot.lane.b32.xlu1 %v1694_v35, %s1880_s0  ;;  %1745 = vrot.lane.b32.xlu0 %v1744_v45, %s1884_s23 }
 0x45b   :  { %846 = vrot.lane.b32.xlu0 %v771_v47, %s1885_s24  ;;  %1700 = vrot.lane.b32.xlu1 %v1699_v54, %s1881_s20 }
 0x45f   :  { %1118 = vrot.lane.b32.xlu0 %v1042_v1, %s1885_s24  ;;  %1705 = vrot.lane.b32.xlu1 %v1704_v19, %s1882_s21 }
 0x463   :  { %1710 = vrot.lane.b32.xlu1 %v1709_v57, %s1881_s20  ;;  %1750 = vrot.lane.b32.xlu0 %v1749_v58, %s1878_s10 }
 0x467   :  { %1715 = vrot.lane.b32.xlu1 %v1714_v33, %s1882_s21  ;;  %1755 = vrot.lane.b32.xlu0 %v1754_v59, %s1878_s10 }
 0x46b   :  { %1725 = vrot.lane.b32.xlu1 %v1724_v31, %s1883_s22 }
 0x46f   :  { %1730 = vrot.lane.b32.xlu1 %v1729_v3, %s1883_s22 }
 0x473   :  { %1740 = vrot.lane.b32.xlu1 %v1739_v62, %s1884_s23 }
 0x477   :  { %848 = vrot.lane.b32.xlu1 %v772_v32, %s1885_s24  ;;  %v1662_v32 = vunpack.i.l.bf16 %v2367_v34 }
 0x47b   :  { %1116 = vrot.lane.b32.xlu1 %v1041_v53, %s1885_s24 }
 0x4b9   :  { %v1666_v40 = vpop.permute.xlu1 %1665  ;;  %v2375_v12 = vpop.permute.xlu0 %1680 }
 0x4ba   :  { %v1668_v29 = vunpack.i.h.bf16 %v1666_v40  ;;  %v1667_v43 = vunpack.i.l.bf16 %v1666_v40  ;;  %v1683_v6 = vunpack.i.h.bf16 %v2375_v12  ;;  %v1682_v28 = vunpack.i.l.bf16 %v2375_v12 }
 0x4bb   :  { %v1657_v12 = vunpack.i.l.bf16 %v2369_v55 }
 0x4bc   :  { %v784_v61 = vsel %vm121_vm1, %v1667_v43, %v1668_v29  ;;  %v783_v46 = vsel %vm121_vm1, %v1652_v15, %v1667_v43  ;;  %v1081_v45 = vsel %vm77_vm5, %v1682_v28, %v1683_v6 }
 0x4bd   :  { %v1759_v27 = vpack.i.bf16 %v1668_v29, %v784_v61  ;;  %v1769_v2 = vpack.i.bf16 %v783_v46, %v2089_v41  ;;  %v1671_v4 = vpop.permute.xlu1 %1670  ;;  %v1686_v11 = vpop.permute.xlu0 %1685  ;;  %v1784_v54 = vpack.i.bf16 %v1683_v6, %v1081_v45 }
 0x4be   :  { %v1673_v17 = vunpack.i.h.bf16 %v1671_v4  ;;  %v1672_v7 = vunpack.i.l.bf16 %v1671_v4  ;;  %v1688_v5 = vunpack.i.h.bf16 %v1686_v11  ;;  %v1687_v16 = vunpack.i.l.bf16 %v1686_v11 }
 0x4bf   :  { %1760 = vrot.lane.b32.xlu1 %v1759_v27, %s1878_s10  ;;  %1770 = vrot.lane.b32.xlu0 %v1769_v2, %s1878_s10 }
 0x4c0   :  { %v1054_v14 = vsel %vm121_vm1, %v1672_v7, %v1673_v17  ;;  %v1053_v24 = vsel %vm121_vm1, %v1653_v13, %v1672_v7  ;;  %v841_v51 = vsel %vm237_vm6, %v1687_v16, %v1688_v5 }
 0x4c1   :  { %v1764_v21 = vpack.i.bf16 %v1673_v17, %v1054_v14  ;;  %v1676_v60 = vpop.permute.xlu1 %1675  ;;  %v2388_v18 = vpop.permute.xlu0 %1720  ;;  %v1774_v25 = vpack.i.bf16 %v1053_v24, %v2089_v41 }
 0x4c2   :  { %v1678_v9 = vunpack.i.h.bf16 %v1676_v60  ;;  %v1677_v36 = vunpack.i.l.bf16 %v1676_v60  ;;  %v1722_v0 = vunpack.i.l.bf16 %v2388_v18 }
 0x4c3   :  { %1765 = vrot.lane.b32.xlu1 %v1764_v21, %s1878_s10 }
 0x4c4   :  { %v811_v8 = vsel %vm77_vm5, %v1677_v36, %v1678_v9  ;;  %v1799_v52 = vpack.i.bf16 %v1722_v0, %v1677_v36 }
 0x4c5   :  { %v1779_v26 = vpack.i.bf16 %v1678_v9, %v811_v8  ;;  %v1691_v35 = vpop.permute.xlu1 %1690  ;;  %v1736_v41 = vpop.permute.xlu0 %1735 }
 0x4c6   :  { %v1692_v48 = vunpack.i.l.bf16 %v1691_v35  ;;  %v1693_v23 = vunpack.i.h.bf16 %v1691_v35  ;;  %v1737_v50 = vunpack.i.l.bf16 %v1736_v41  ;;  %v1738_v4 = vunpack.i.h.bf16 %v1736_v41 }
 0x4c7   :  { %1775 = vrot.lane.b32.xlu1 %v1774_v25, %s1878_s10  ;;  %1780 = vrot.lane.b32.xlu0 %v1779_v26, %s1878_s10 }
 0x4c8   :  { %v842_v47 = vsel %vm237_vm6, %v1688_v5, %v1692_v48  ;;  %v1809_v33 = vpack.i.bf16 %v1687_v16, %v1737_v50  ;;  %v832_v6 = vsel %vm227_vm11, %v1737_v50, %v1738_v4 }
 0x4c9   :  { %v1789_v49 = vpack.i.bf16 %v842_v47, %v841_v51  ;;  %v1696_v1 = vpop.permute.xlu1 %1695  ;;  %v1746_v17 = vpop.permute.xlu0 %1745  ;;  %v1663_v51 = vunpack.i.h.bf16 %v2367_v34 }
 0x4ca   :  { %v1698_v19 = vunpack.i.h.bf16 %v1696_v1  ;;  %v1697_v56 = vunpack.i.l.bf16 %v1696_v1  ;;  %v1748_v21 = vunpack.i.h.bf16 %v1746_v17  ;;  %v1747_v60 = vunpack.i.l.bf16 %v1746_v17 }
 0x4cb   :  { %1790 = vrot.lane.b32.xlu1 %v1789_v49, %s1878_s10  ;;  %1785 = vrot.lane.b32.xlu0 %v1784_v54, %s1878_s10  ;;  %v1658_v49 = vunpack.i.h.bf16 %v2369_v55 }
 0x4cc   :  { %v1111_v44 = vsel %vm237_vm6, %v1693_v23, %v1697_v56  ;;  %v1112_v38 = vsel %vm237_vm6, %v1697_v56, %v1698_v19  ;;  %v1103_v25 = vsel %vm227_vm11, %v1747_v60, %v1748_v21  ;;  %v1723_v19 = vunpack.i.h.bf16 %v2388_v18 }
 0x4cd   :  { %v1794_v57 = vpack.i.bf16 %v1112_v38, %v1111_v44  ;;  %v1701_v58 = vpop.permute.xlu1 %1700  ;;  %v847_v47 = vpop.permute.xlu0 %846 }
 0x4ce   :  { %v1703_v39 = vunpack.i.h.bf16 %v1701_v58  ;;  %v1702_v30 = vunpack.i.l.bf16 %v1701_v58  ;;  %v821_v58 = vsel %vm215_vm9, %v1722_v0, %v1723_v19 }
 0x4cf   :  { %1795 = vrot.lane.b32.xlu1 %v1794_v57, %s1878_s10  ;;  %1800 = vrot.lane.b32.xlu0 %v1799_v52, %s1878_s10 }
 0x4d0   :  { %v795_v20 = vsel %vm186_vm8, %v1702_v30, %v1703_v39  ;;  %v794_v29 = vsel %vm186_vm8, %v1657_v12, %v1702_v30 }
 0x4d1   :  { %v1706_v59 = vpop.permute.xlu1 %1705  ;;  %v1819_v31 = vpack.i.bf16 %v1703_v39, %v795_v20  ;;  %v1119_v38 = vpop.permute.xlu0 %1118 }
 0x4d2   :  { %v1707_v3 = vunpack.i.l.bf16 %v1706_v59  ;;  %v1708_v7 = vunpack.i.h.bf16 %v1706_v59  ;;  %v1123_v18 = vsel %vm249_vm10, %v1119_v38, %v2373_v22 }
 0x4d3   :  { %1810 = vrot.lane.b32.xlu0 %v1809_v33, %s1878_s10 }
 0x4d4   :  { %v805_v15 = vsel %vm198_vm7, %v1662_v32, %v1707_v3  ;;  %v806_v36 = vsel %vm198_vm7, %v1707_v3, %v1708_v7 }
 0x4d5   :  { %v1711_v42 = vpop.permute.xlu1 %1710  ;;  %v1839_v43 = vpack.i.bf16 %v805_v15, %v794_v29  ;;  %v1824_v26 = vpack.i.bf16 %v1708_v7, %v806_v36  ;;  %v1751_v0 = vpop.permute.xlu0 %1750 }
 0x4d6   :  { %v1713_v10 = vunpack.i.h.bf16 %v1711_v42  ;;  %v1712_v62 = vunpack.i.l.bf16 %v1711_v42  ;;  %v1753_v42 = vunpack.i.h.bf16 %v1751_v0  ;;  %v1752_v3 = vunpack.i.l.bf16 %v1751_v0 }
 0x4d7   :  { %1820 = vrot.lane.b32.xlu0 %v1819_v31, %s1878_s10 }
 0x4d8   :  { %v1065_v53 = vsel %vm186_vm8, %v1712_v62, %v1713_v10  ;;  %v1064_v56 = vsel %vm186_vm8, %v1658_v49, %v1712_v62  ;;  %v912_v12 = vsel %vm158_vm4, %v1752_v3, %v1753_v42 }
 0x4d9   :  { %v1829_v63 = vpack.i.bf16 %v1713_v10, %v1065_v53  ;;  %v1716_v40 = vpop.permute.xlu1 %1715  ;;  %v1756_v31 = vpop.permute.xlu0 %1755 }
 0x4da   :  { %v1718_v5 = vunpack.i.h.bf16 %v1716_v40  ;;  %v1757_v15 = vunpack.i.l.bf16 %v1756_v31 }
 0x4db   :  { %1830 = vrot.lane.b32.xlu0 %v1829_v63, %s1878_s10 }
 0x4dd   :  { %v1726_v61 = vpop.permute.xlu1 %1725 }
 0x4de   :  { %v1728_v46 = vunpack.i.h.bf16 %v1726_v61 }
 0x4df   :  { %1840 = vrot.lane.b32.xlu0 %v1839_v43, %s1878_s10 }
 0x4e0   :  { %v1804_v27 = vpack.i.bf16 %v1728_v46, %v1682_v28  ;;  %v1717_v28 = vunpack.i.l.bf16 %v1716_v40 }
 0x4e1   :  { %v1731_v2 = vpop.permute.xlu1 %1730 }
 0x4e2   :  { %1805 = vrot.lane.b32.xlu1 %v1804_v27, %s1878_s10  ;;  %v1076_v35 = vsel %vm198_vm7, %v1717_v28, %v1718_v5  ;;  %v1075_v1 = vsel %vm198_vm7, %v1663_v51, %v1717_v28  ;;  %v1733_v50 = vunpack.i.h.bf16 %v1731_v2  ;;  %v1732_v55 = vunpack.i.l.bf16 %v1731_v2 }
 0x4e3   :  { %v1834_v54 = vpack.i.bf16 %v1718_v5, %v1076_v35  ;;  %v1844_v34 = vpack.i.bf16 %v1075_v1, %v1064_v56 }
 0x4e4   :  { %v1091_v30 = vsel %vm215_vm9, %v1728_v46, %v1732_v55  ;;  %v1092_v33 = vsel %vm215_vm9, %v1732_v55, %v1733_v50 }
 0x4e5   :  { %v1741_v11 = vpop.permute.xlu1 %1740  ;;  %v1854_v59 = vpack.i.bf16 %v1092_v33, %v1091_v30 }
 0x4e6   :  { %v1743_v13 = vunpack.i.h.bf16 %v1741_v11  ;;  %v1742_v14 = vunpack.i.l.bf16 %v1741_v11 }
 0x4e8   :  { %v1814_v24 = vpack.i.bf16 %v1693_v23, %v1743_v13  ;;  %v833_v9 = vsel %vm227_vm11, %v1738_v4, %v1742_v14  ;;  %v1102_v8 = vsel %vm227_vm11, %v1743_v13, %v1747_v60  ;;  %v1727_v23 = vunpack.i.l.bf16 %v1726_v61 }
 0x4e9   :  { %v1859_v16 = vpack.i.bf16 %v833_v9, %v832_v6  ;;  %v1864_v45 = vpack.i.bf16 %v1103_v25, %v1102_v8  ;;  %v849_v48 = vpop.permute.xlu1 %848 }
 0x4ea   :  { %1815 = vrot.lane.b32.xlu1 %v1814_v24, %s1878_s10  ;;  %v852_v41 = vsel %vm249_vm10, %v847_v47, %v849_v48  ;;  %v822_v52 = vsel %vm215_vm9, %v1723_v19, %v1727_v23  ;;  %v853_v20 = vsel %vm249_vm10, %v849_v48, %v2371_v37  ;;  %v1758_v37 = vunpack.i.h.bf16 %v1756_v31 }
 0x4eb   :  { %1860 = vrot.lane.b32.xlu0 %v1859_v16, %s1878_s10  ;;  %v1849_v39 = vpack.i.bf16 %v822_v52, %v821_v58 }
 0x4ec   :  { %v1182_v17 = vsel %vm158_vm4, %v1757_v15, %v1758_v37 }
 0x4ed   :  { %v1117_v44 = vpop.permute.xlu1 %1116 }
 0x4ee   :  { %1825 = vrot.lane.b32.xlu1 %v1824_v26, %s1878_s10  ;;  %v1122_v57 = vsel %vm249_vm10, %v1117_v44, %v1119_v38 }
 0x4ef   :  { %1865 = vrot.lane.b32.xlu0 %v1864_v45, %s1878_s10 }
 0x4f2   :  { %1835 = vrot.lane.b32.xlu1 %v1834_v54, %s1878_s10 }
 0x4f3   :  { %907 = vrot.lane.b32.xlu0 %v852_v41, %s1878_s10 }
 0x4f6   :  { %1845 = vrot.lane.b32.xlu1 %v1844_v34, %s1878_s10 }
 0x4f7   :  { %1177 = vrot.lane.b32.xlu0 %v1122_v57, %s1878_s10 }
 0x4fa   :  { %1850 = vrot.lane.b32.xlu1 %v1849_v39, %s1878_s10 }
 0x4fb   :  { %905 = vrot.lane.b32.xlu0 %v847_v47, %s1878_s10 }
 0x4fe   :  { %1855 = vrot.lane.b32.xlu1 %v1854_v59, %s1878_s10 }
 0x502   :  { %909 = vrot.lane.b32.xlu1 %v853_v20, %s1878_s10 }
 0x506   :  { %1179 = vrot.lane.b32.xlu1 %v1123_v18, %s1878_s10 }
 0x50a   :  { %1175 = vrot.lane.b32.xlu1 %v1117_v44, %s1878_s10 }
 0x531   :  { %v1761_v10 = vpop.permute.xlu1 %1760  ;;  %v1771_v62 = vpop.permute.xlu0 %1770 }
 0x532   :  { %v1763_v32 = vunpack.i.h.bf16 %v1761_v10  ;;  %v1762_v53 = vunpack.i.l.bf16 %v1761_v10  ;;  %v1773_v63 = vunpack.i.h.bf16 %v1771_v62  ;;  %v1772_v40 = vunpack.i.l.bf16 %v1771_v62 }
 0x534   :  { %v913_v22 = vsel %vm158_vm4, %v1773_v63, %v1762_v53  ;;  %v911_v29 = vsel %vm158_vm4, %v1772_v40, %v1752_v3  ;;  %v914_v43 = vsel %vm158_vm4, %v1762_v53, %v1763_v32 }
 0x535   :  { %v1383_v61 = vpack.c.bf16 %v913_v22, %v911_v29  ;;  %v1766_v46 = vpop.permute.xlu1 %1765  ;;  %v1381_v27 = vpack.c.bf16 %v914_v43, %v912_v12 }
 0x536   :  { %v1768_v2 = vunpack.i.h.bf16 %v1766_v46  ;;  %v1767_v4 = vunpack.i.l.bf16 %v1766_v46 }
 0x537   :  { %1382 = vmatprep.subr.bf16.mxu0 %v1381_v27 }
 0x538   :  { %1384 = vmatpush1.bf16.msra.mxu0 %v1383_v61  ;;  %v1184_v7 = vsel %vm158_vm4, %v1767_v4, %v1768_v2 }
 0x539   :  { %v1776_v11 = vpop.permute.xlu1 %1775  ;;  %v2459_v13 = vpop.permute.xlu0 %1780  ;;  %v1397_v14 = vpack.c.bf16 %v1184_v7, %v1182_v17 }
 0x53a   :  { %v1778_v6 = vunpack.i.h.bf16 %v1776_v11  ;;  %v1777_v21 = vunpack.i.l.bf16 %v1776_v11  ;;  %v1783_v18 = vunpack.i.h.bf16 %v2459_v13  ;;  %v1782_v0 = vunpack.i.l.bf16 %v2459_v13 }
 0x53b   :  { %1398 = vmatprep.subr.bf16.mxu1 %v1397_v14 }
 0x53c   :  { %v1181_v60 = vsel %vm158_vm4, %v1777_v21, %v1757_v15  ;;  %v1183_v24 = vsel %vm158_vm4, %v1778_v6, %v1767_v4  ;;  %v920_v46 = vsel %vm158_vm4, %v1782_v0, %v1783_v18 }
 0x53d   :  { %v1399_v9 = vpack.c.bf16 %v1183_v24, %v1181_v60  ;;  %v2463_v36 = vpop.permute.xlu0 %1785  ;;  %v2469_v16 = vpop.permute.xlu1 %1790 }
 0x53e   :  { %v1793_v3 = vunpack.i.h.bf16 %v2469_v16  ;;  %v1792_v10 = vunpack.i.l.bf16 %v2469_v16  ;;  %v1788_v22 = vunpack.i.h.bf16 %v2463_v36  ;;  %v1787_v29 = vunpack.i.l.bf16 %v2463_v36 }
 0x53f   :  { %1400 = vmatpush1.bf16.msra.mxu1 %v1399_v9 }
 0x540   :  { %v926_v17 = vsel %vm158_vm4, %v1792_v10, %v1793_v3 }
 0x541   :  { %v2465_v5 = vpop.permute.xlu0 %1800  ;;  %v2471_v25 = vpop.permute.xlu1 %1795 }
 0x542   :  { %v1802_v53 = vunpack.i.l.bf16 %v2465_v5  ;;  %v1803_v27 = vunpack.i.h.bf16 %v2465_v5  ;;  %v1798_v9 = vunpack.i.h.bf16 %v2471_v25 }
 0x544   :  { %v919_v7 = vsel %vm158_vm4, %v1802_v53, %v1782_v0 }
 0x545   :  { %v2467_v28 = vpop.permute.xlu0 %1810 }
 0x546   :  { %v1813_v11 = vunpack.i.h.bf16 %v2467_v28  ;;  %v1812_v36 = vunpack.i.l.bf16 %v2467_v28 }
 0x549   :  { %v1821_v8 = vpop.permute.xlu0 %1820 }
 0x54a   :  { %v1823_v51 = vunpack.i.h.bf16 %v1821_v8  ;;  %v1822_v47 = vunpack.i.l.bf16 %v1821_v8 }
 0x54c   :  { %v916_v44 = vsel %vm158_vm4, %v1822_v47, %v1823_v51 }
 0x54d   :  { %v1831_v26 = vpop.permute.xlu0 %1830 }
 0x54e   :  { %v1833_v56 = vunpack.i.h.bf16 %v1831_v26  ;;  %v1832_v34 = vunpack.i.l.bf16 %v1831_v26  ;;  %v1797_v26 = vunpack.i.l.bf16 %v2471_v25 }
 0x550   :  { %v1186_v59 = vsel %vm158_vm4, %v1832_v34, %v1833_v56 }
 0x551   :  { %v1841_v45 = vpop.permute.xlu0 %1840 }
 0x552   :  { %v1842_v54 = vunpack.i.l.bf16 %v1841_v45  ;;  %v1843_v23 = vunpack.i.h.bf16 %v1841_v45 }
 0x554   :  { %v2473_v35 = vpop.permute.xlu1 %1805  ;;  %v915_v38 = vsel %vm158_vm4, %v1842_v54, %v1822_v47 }
 0x555   :  { %v1807_v13 = vunpack.i.l.bf16 %v2473_v35  ;;  %v1808_v45 = vunpack.i.h.bf16 %v2473_v35 }
 0x557   :  { %v1189_v28 = vsel %vm158_vm4, %v1807_v13, %v1787_v29 }
 0x55c   :  { %v2475_v48 = vpop.permute.xlu1 %1815 }
 0x55d   :  { %v2477_v49 = vpop.permute.xlu0 %1860  ;;  %v1818_v56 = vunpack.i.h.bf16 %v2475_v48 }
 0x55e   :  { %v1863_v63 = vunpack.i.h.bf16 %v2477_v49  ;;  %v1862_v40 = vunpack.i.l.bf16 %v2477_v49  ;;  %v925_v49 = vsel %vm158_vm4, %v1813_v11, %v1792_v10  ;;  %v751_v11 = vld [vmem:[%s2562_s7] sm:$0xff] }
 0x560   :  { %v1826_v1 = vpop.permute.xlu1 %1825  ;;  %v924_v14 = vsel %vm158_vm4, %v1862_v40, %v1863_v63 }
 0x561   :  { %v1828_v41 = vunpack.i.h.bf16 %v1826_v1  ;;  %v1827_v19 = vunpack.i.l.bf16 %v1826_v1  ;;  %v2483_v39 = vpop.permute.xlu0 %1865  ;;  %v923_v1 = vsel %vm158_vm4, %v1812_v36, %v1862_v40 }
 0x562   :  { %v1868_v6 = vunpack.i.h.bf16 %v2483_v39  ;;  %v1867_v21 = vunpack.i.l.bf16 %v2483_v39 }
 0x563   :  { %v917_v52 = vsel %vm158_vm4, %v1843_v23, %v1827_v19  ;;  %v918_v50 = vsel %vm158_vm4, %v1827_v19, %v1828_v41  ;;  %v1393_v23 = vpack.c.bf16 %v926_v17, %v924_v14  ;;  %v1190_v41 = vsel %vm158_vm4, %v1787_v29, %v1788_v22 }
 0x564   :  { %v1387_v55 = vpack.c.bf16 %v917_v52, %v915_v38  ;;  %v1836_v57 = vpop.permute.xlu1 %1835  ;;  %v1385_v58 = vpack.c.bf16 %v918_v50, %v916_v44  ;;  %v1194_v35 = vsel %vm158_vm4, %v1867_v21, %v1868_v6  ;;  %v1817_v44 = vunpack.i.l.bf16 %v2475_v48 }
 0x565   :  { %v1838_v30 = vunpack.i.h.bf16 %v1836_v57  ;;  %v1837_v33 = vunpack.i.l.bf16 %v1836_v57  ;;  %v2494_v37 = vpop.permute.xlu0 %907  ;;  %v1395_v50 = vpack.c.bf16 %v925_v49, %v923_v1 }
 0x566   :  { %1386 = vmatprep.subr.bf16.mxu0 %v1385_v58  ;;  %v1193_v57 = vsel %vm158_vm4, %v1817_v44, %v1867_v21 }
 0x567   :  { %1388 = vmatpush1.bf16.msra.mxu0 %v1387_v55  ;;  %v1188_v20 = vsel %vm158_vm4, %v1837_v33, %v1838_v30  ;;  %v1196_v55 = vsel %vm158_vm4, %v1797_v26, %v1798_v9 }
 0x568   :  { %v1846_v31 = vpop.permute.xlu1 %1845  ;;  %v1401_v42 = vpack.c.bf16 %v1188_v20, %v1186_v59  ;;  %v1409_v58 = vpack.c.bf16 %v1196_v55, %v1194_v35  ;;  %v749_v20 = vld [vmem:[%s2561_s5] sm:$0xff] }
 0x569   :  { %v1848_v62 = vunpack.i.h.bf16 %v1846_v31  ;;  %v1847_v32 = vunpack.i.l.bf16 %v1846_v31  ;;  %v1178_v51 = vpop.permute.xlu0 %1177 }
 0x56a   :  { %1402 = vmatprep.subr.bf16.mxu1 %v1401_v42 }
 0x56b   :  { %v1187_v12 = vsel %vm158_vm4, %v1848_v62, %v1837_v33  ;;  %v1185_v15 = vsel %vm158_vm4, %v1847_v32, %v1832_v34  ;;  %v1195_v33 = vsel %vm158_vm4, %v1818_v56, %v1797_v26 }
 0x56c   :  { %v1403_v43 = vpack.c.bf16 %v1187_v12, %v1185_v15  ;;  %v1851_v61 = vpop.permute.xlu1 %1850  ;;  %v1411_v59 = vpack.c.bf16 %v1195_v33, %v1193_v57 }
 0x56d   :  { %v1853_v2 = vunpack.i.h.bf16 %v1851_v61  ;;  %v1852_v4 = vunpack.i.l.bf16 %v1851_v61  ;;  %v906_v39 = vpop.permute.xlu0 %905 }
 0x56e   :  { %1404 = vmatpush1.bf16.msra.mxu1 %v1403_v43  ;;  %v927_v18 = vsel %vm158_vm4, %v906_v39, %v2494_v37 }
 0x56f   :  { %v921_v60 = vsel %vm158_vm4, %v1803_v27, %v1852_v4  ;;  %v922_v24 = vsel %vm158_vm4, %v1852_v4, %v1853_v2 }
 0x570   :  { %v1391_v5 = vpack.c.bf16 %v921_v60, %v919_v7  ;;  %v1856_v16 = vpop.permute.xlu1 %1855  ;;  %v1389_v8 = vpack.c.bf16 %v922_v24, %v920_v46  ;;  %v750_v24 = vld [vmem:[%s2563_s6] sm:$0xff] }
 0x571   :  { %v1858_v47 = vunpack.i.h.bf16 %v1856_v16  ;;  %v1857_v54 = vunpack.i.l.bf16 %v1856_v16 }
 0x572   :  { %1390 = vmatprep.subr.bf16.mxu0 %v1389_v8 }
 0x573   :  { %v1191_v19 = vsel %vm158_vm4, %v1808_v45, %v1857_v54  ;;  %1392 = vmatpush1.bf16.msra.mxu0 %v1391_v5  ;;  %v1192_v25 = vsel %vm158_vm4, %v1857_v54, %v1858_v47 }
 0x574   :  { %v1407_v34 = vpack.c.bf16 %v1191_v19, %v1189_v28  ;;  %v910_v38 = vpop.permute.xlu1 %909  ;;  %1394 = vmatprep.subr.bf16.mxu0 %v1393_v23  ;;  %v1405_v52 = vpack.c.bf16 %v1192_v25, %v1190_v41 }
 0x575   :  { %v928_v30 = vsel %vm158_vm4, %v2494_v37, %v910_v38 }
 0x576   :  { %1406 = vmatprep.subr.bf16.mxu1 %v1405_v52 }
 0x577   :  { %1396 = vmatpush1.bf16.msra.mxu0 %v1395_v50  ;;  %1408 = vmatpush1.bf16.msra.mxu1 %v1407_v34 }
 0x578   :  { %v1180_v48 = vpop.permute.xlu1 %1179  ;;  %966 = vmatprep.subr.mxu0 %v928_v30  ;;  %1410 = vmatprep.subr.bf16.mxu1 %v1409_v58 }
 0x579   :  { %v1198_v0 = vsel %vm158_vm4, %v1178_v51, %v1180_v48 }
 0x57b   :  { %967 = vmatpush1.msra.mxu0 %v927_v18  ;;  %1412 = vmatpush1.bf16.msra.mxu1 %v1411_v59 }
 0x57c   :  { %v1176_v31 = vpop.permute.xlu1 %1175  ;;  %1233 = vmatprep.subr.mxu1 %v1198_v0  ;;  %1347 = vmatmul.mubr.msk.f32.vlgmr.msra.gmra.mrb[2].mxu0 %vm345_vm12, %v749_v20 }
 0x57d   :  { %v1197_v42 = vsel %vm158_vm4, %v1176_v31, %v1178_v51 }
 0x57f   :  { %1234 = vmatpush1.msra.mxu1 %v1197_v42 }
 0x580   :  { %1348 = vmatmul.mubr.msk.f32.vlgmr.msra.gmra.mrb[2].mxu1 %vm345_vm12, %v749_v20 }
 0x64f   :  { %v1016_v3 = vpop.f32.mrb[2].mxu0 }
 0x650   :  { %v1018_v10 = vpop.f32.mrb[3].mxu0 }
 0x651   :  { %v1288_v62 = vadd.f32 %v1018_v10, %v1016_v3 }
 0x653   :  { %v1283_v32 = vpop.f32.mrb[2].mxu1  ;;  %1289 = vadd.xlane.f32.xlu0 %v1288_v62 }
 0x654   :  { %v1285_v53 = vpop.f32.mrb[3].mxu1 }
 0x655   :  { %v1291_v63 = vadd.f32 %v1285_v53, %v1283_v32 }
 0x657   :  { %1292 = vadd.xlane.f32.xlu1 %v1291_v63 }
 0x6e0   :  { %v1290_v40 = vpop.xlane.xlu0 %1289 }
 0x6e4   :  { %v1293_v37 = vpop.xlane.xlu1 %1292 }
 0x6e5   :  { %v1294_v12 = vadd.f32 %v1293_v37, %v1290_v40 }
 0x6e7   :  { %v1295_v15 = vmul.f32 0.001953125, %v1294_v12 }
 0x6e9   :  { %v1296_v22 = vsub.f32 %v1016_v3, %v1295_v15  ;;  %v1297_v29 = vsub.f32 %v1018_v10, %v1295_v15  ;;  %v1298_v43 = vsub.f32 %v1283_v32, %v1295_v15  ;;  %v1299_v61 = vsub.f32 %v1285_v53, %v1295_v15 }
 0x6eb   :  { %v1300_v46 = vmul.f32 %v1296_v22, %v1296_v22  ;;  %v1301_v27 = vmul.f32 %v1297_v29, %v1297_v29  ;;  %v1302_v4 = vmul.f32 %v1298_v43, %v1298_v43  ;;  %v1303_v17 = vmul.f32 %v1299_v61, %v1299_v61 }
 0x6ed   :  { %v1304_v2 = vadd.f32 %v1301_v27, %v1300_v46  ;;  %v1307_v7 = vadd.f32 %v1303_v17, %v1302_v4 }
 0x6ef   :  { %1305 = vadd.xlane.f32.xlu0 %v1304_v2 }
 0x6f3   :  { %1308 = vadd.xlane.f32.xlu0 %v1307_v7 }
 0x709   :  { %1326 = vperm.xlu0 %1648, %v751_v11  }
 0x77c   :  { %v1306_v13 = vpop.xlane.xlu0 %1305 }
 0x780   :  { %v1309_v14 = vpop.xlane.xlu0 %1308 }
 0x781   :  { %v1310_v6 = vadd.f32 %v1309_v14, %v1306_v13 }
 0x783   :  { %v1311_v21 = vmul.f32 0.001953125, %v1310_v6 }
 0x785   :  { %v1312_v60 = vadd.f32 1e-05, %v1311_v21 }
 0x787   :  { %1871 = vrsqrt.f32 %v1312_v60 }
 0x788   :  { %v1327_v51 = vpop.permute.xlu0 %1326 }
 0x791   :  { %v1872_v9 = vpop.eup %1871 }
 0x792   :  { %v1314_v36 = vmul.f32 %v1872_v9, %v750_v24 }
 0x794   :  { %1317 = vperm.xlu1 %1647, %v1314_v36  }
 0x813   :  { %v1318_v5 = vpop.permute.xlu1 %1317 }
 0x814   :  { %v1320_v16 = vmul.f32 %v1318_v5, %v1296_v22  ;;  %v1321_v8 = vmul.f32 %v1318_v5, %v1297_v29  ;;  %v1322_v26 = vmul.f32 %v1318_v5, %v1298_v43  ;;  %v1323_v45 = vmul.f32 %v1318_v5, %v1299_v61 }
 0x816   :  { %v1329_v47 = vadd.f32 %v1327_v51, %v1320_v16  ;;  %v1330_v54 = vadd.f32 %v1327_v51, %v1321_v8  ;;  %v1331_v49 = vadd.f32 %v1327_v51, %v1322_v26  ;;  %v1332_v1 = vadd.f32 %v1327_v51, %v1323_v45 }
 0x818   :  { %v1333_v23 = vmax.f32 %v1329_v47, 0.0  ;;  %v1334_v41 = vmax.f32 %v1330_v54, 0.0  ;;  %v1335_v28 = vmax.f32 %v1331_v49, 0.0  ;;  %v1336_v19 = vmax.f32 %v1332_v1, 0.0 }
 0x81a   :  { %1337 = vst [vmem:[%s2564_s8] sm:$0xff] %v1333_v23  ;;  %1338 = vst [vmem:[%s2564_s8 + $0x8] sm:$0xff] %v1334_v41 }
 0x81b   :  { %1339 = vst [vmem:[%s2564_s8 + $0x10] sm:$0xff] %v1335_v28  ;;  %1340 = vst [vmem:[%s2564_s8 + $0x18] sm:$0xff] %v1336_v19 }

</bundles_post_ra>
